<compile_context>
chip_gen: v7x
topology: tpu7x:2x2x1
jax: 0.10.0
libtpu: 0.0.40
codegen_flags: <defaults>
</compile_context>

<pallas_src>
import functools

import numpy as np
import jax
import jax.numpy as jnp
from jax.experimental import pallas as pl
from jax.experimental.pallas import tpu as pltpu

# Small test configuration (ModelConfig equivalent).
D_CONV_DIM = 8      # config.d_conv_dim
C_DIM = 4           # config.c_dim
D_REPEAT_NUM = 2    # config.d_repeat_num
IMAGE_SIZE = 16


# ---------------------------------------------------------------- conv kernel

def _conv_img_kernel(x_ref, w_ref, b_ref, o_ref, *, K, Ho, Wo, negative_slope):
    """One batch item: full stride-1 conv + bias + LeakyReLU, weights resident.

    x_ref : (1, Hin, Win, Cin)  spatially padded input image
    w_ref : (K, K, Cin, Cout)   bf16 weights, constant index_map (resident)
    b_ref : (1, Cout)           f32 bias
    o_ref : (1, Ho, Wo, Cout)   output image (bf16 for hidden layers)
    """
    x = x_ref[0].astype(jnp.bfloat16)                 # cast whole block once
    taps = [[w_ref[kh, kw] for kw in range(K)] for kh in range(K)]
    cout = b_ref.shape[-1]
    bias = jnp.broadcast_to(b_ref[...], (Wo, cout))   # hoisted out of the loop

    for r in range(Ho):                               # static unroll over rows
        acc = bias
        for kh in range(K):
            xrow = x[r + kh]                          # (Win, Cin) bf16
            for kw in range(K):
                acc = acc + jnp.dot(xrow[kw:kw + Wo, :], taps[kh][kw],
                                    preferred_element_type=jnp.float32)
        if negative_slope is not None:
            acc = jnp.where(acc >= 0.0, acc, negative_slope * acc)
        o_ref[0, r] = acc.astype(o_ref.dtype)


# --------------------------------------------------------------- conv wrapper

def _space_to_depth(x):
    n, h, w, c = x.shape
    x = x.reshape(n, h // 2, 2, w // 2, 2, c)
    x = jnp.transpose(x, (0, 1, 3, 2, 4, 5))
    return x.reshape(n, h // 2, w // 2, 4 * c)


def conv2d_lrelu(x, w, b, *, stride, pad, negative_slope=None,
                 out_dtype=jnp.bfloat16):
    """Fused Conv2d + bias + LeakyReLU on NHWC input, real (unpadded) channels.

    x : (N, H, W, Cin) f32 or bf16
    w : PyTorch layout (Cout, Cin, K, K), b : (Cout,)
    Returns (N, Ho, Wo, Cout) in `out_dtype`.
    """
    n = x.shape[0]
    cout, cin, k, _ = w.shape
    assert x.shape[-1] == cin

    wk = jnp.transpose(w, (2, 3, 1, 0))               # (K, K, Cin, Cout)
    xp = jnp.pad(x, ((0, 0), (pad, pad), (pad, pad), (0, 0)))

    if stride == 2:
        # Sub-pixel (space-to-depth) decomposition -> equivalent stride-1 conv
        # with (K/2)x(K/2) taps over 4*Cin channels; no strided gathers.
        assert k % 2 == 0 and xp.shape[1] % 2 == 0 and xp.shape[2] % 2 == 0
        xp = _space_to_depth(xp)
        wk = wk.reshape(k // 2, 2, k // 2, 2, cin, cout)
        wk = jnp.transpose(wk, (0, 2, 1, 3, 4, 5))
        k, cin = k // 2, 4 * cin
        wk = wk.reshape(k, k, cin, cout)
    elif stride != 1:
        raise NotImplementedError("only stride 1 or 2 are used by this model")

    hin, win = xp.shape[1], xp.shape[2]
    ho, wo = hin - k + 1, win - k + 1

    w_taps = wk.astype(jnp.bfloat16)                  # (K, K, Cin, Cout)
    b_row = b.astype(jnp.float32).reshape(1, cout)

    kernel = functools.partial(_conv_img_kernel, K=k, Ho=ho, Wo=wo,
                               negative_slope=negative_slope)
    return pl.pallas_call(
        kernel,
        out_shape=jax.ShapeDtypeStruct((n, ho, wo, cout), out_dtype),
        grid=(n,),
        in_specs=[
            pl.BlockSpec((1, hin, win, cin), lambda bi: (bi, 0, 0, 0)),
            pl.BlockSpec((k, k, cin, cout), lambda bi: (0, 0, 0, 0)),   # resident
            pl.BlockSpec((1, cout), lambda bi: (0, 0)),                 # resident
        ],
        out_specs=pl.BlockSpec((1, ho, wo, cout), lambda bi: (bi, 0, 0, 0)),
        compiler_params=pltpu.CompilerParams(
            dimension_semantics=("parallel",)),       # megacore on v7x
    )(xp, w_taps, b_row)


# -------------------------------------------------------- fused output heads

def _heads_kernel(h_ref, w_ref, o_ref):
    o_ref[...] = jnp.dot(h_ref[...], w_ref[...],
                         preferred_element_type=jnp.float32)


def _src_head_matrix(w_src, hsz):
    """Dense (hsz*hsz*cin, hsz*hsz) matrix equivalent to the 'same' conv head.

    out_src[n, i, j] = h_flat[n, :] @ M[:, i*hsz + j]   with h_flat layout
    index = (ii*hsz + jj)*cin + c.  Shift matrices are numpy constants.
    """
    _, cin, ks, _ = w_src.shape
    pad = (ks - 1) // 2
    m = jnp.zeros((hsz * hsz, cin, hsz * hsz), jnp.float32)
    for di in range(ks):
        for dj in range(ks):
            s = np.zeros((hsz, hsz, hsz, hsz), np.float32)
            for i in range(hsz):
                for j in range(hsz):
                    ii, jj = i + di - pad, j + dj - pad
                    if 0 <= ii < hsz and 0 <= jj < hsz:
                        s[ii, jj, i, j] = 1.0
            s = jnp.asarray(s.reshape(hsz * hsz, hsz * hsz))
            m = m + s[:, None, :] * w_src[0, :, di, dj][None, :, None]
    return m.reshape(hsz * hsz * cin, hsz * hsz)


def fused_heads(h, w_src, w_cls):
    """Compute both PatchGAN heads as one flattened matmul pallas_call."""
    n, hsz, wsz, cin = h.shape
    assert hsz == wsz
    feat = hsz * hsz * cin
    c_dim = w_cls.shape[0]

    m_src = _src_head_matrix(w_src, hsz)                                # (feat, hsz*hsz)
    w_cls_flat = jnp.transpose(w_cls, (2, 3, 1, 0)).reshape(feat, c_dim)
    w_heads = jnp.concatenate([m_src, w_cls_flat], axis=1).astype(jnp.bfloat16)
    n_out = hsz * hsz + c_dim

    h_flat = h.reshape(n, feat).astype(jnp.bfloat16)
    out = pl.pallas_call(
        _heads_kernel,
        out_shape=jax.ShapeDtypeStruct((n, n_out), jnp.float32),
        grid=(1,),
        in_specs=[pl.BlockSpec((n, feat), lambda i: (0, 0)),
                  pl.BlockSpec((feat, n_out), lambda i: (0, 0))],
        out_specs=pl.BlockSpec((n, n_out), lambda i: (0, 0)),
    )(h_flat, w_heads)

    out_src = out[:, :hsz * hsz].reshape(n, 1, hsz, hsz)    # NCHW, 1 channel
    out_cls = out[:, hsz * hsz:]                            # (N, c_dim)
    return out_src, out_cls


# ------------------------------------------------------------------------ model

def init_params(key):
    p = {}
    keys = list(jax.random.split(key, 2 * D_REPEAT_NUM + 2))

    def draw(shape):
        return jax.random.normal(keys.pop(), shape, jnp.float32) * 0.05

    curr = D_CONV_DIM
    p["w0"] = draw((D_CONV_DIM, 3, 4, 4))
    p["b0"] = draw((D_CONV_DIM,))
    for i in range(1, D_REPEAT_NUM):
        p[f"w{i}"] = draw((curr * 2, curr, 4, 4))
        p[f"b{i}"] = draw((curr * 2,))
        curr *= 2
    ksz = IMAGE_SIZE // (2 ** D_REPEAT_NUM)
    p["w_src"] = draw((1, curr, 3, 3))             # conv1, bias=False
    p["w_cls"] = draw((C_DIM, curr, ksz, ksz))     # conv2, bias=False
    return p


@jax.jit
def discriminator_forward(params, x_nchw):
    """Returns (out_src [N,1,H/2^r,W/2^r], out_cls [N, c_dim])."""
    h = jnp.transpose(x_nchw, (0, 2, 3, 1))                   # NCHW -> NHWC
    h = conv2d_lrelu(h, params["w0"], params["b0"], stride=2, pad=1,
                     negative_slope=0.01)
    for i in range(1, D_REPEAT_NUM):
        h = conv2d_lrelu(h, params[f"w{i}"], params[f"b{i}"], stride=2, pad=1,
                         negative_slope=0.01)
    return fused_heads(h, params["w_src"], params["w_cls"])


# --------------------------------------------------------- pure-JAX reference

def _conv_ref(x, w, b, stride, pad):
    out = jax.lax.conv_general_dilated(
        x, jnp.transpose(w, (2, 3, 1, 0)),
        window_strides=(stride, stride),
        padding=[(pad, pad), (pad, pad)],
        dimension_numbers=("NHWC", "HWIO", "NHWC"))
    return out if b is None else out + b


def discriminator_ref(params, x_nchw):
    lrelu = lambda v: jnp.where(v >= 0.0, v, 0.01 * v)
    h = jnp.transpose(x_nchw, (0, 2, 3, 1))
    h = lrelu(_conv_ref(h, params["w0"], params["b0"], 2, 1))
    for i in range(1, D_REPEAT_NUM):
        h = lrelu(_conv_ref(h, params[f"w{i}"], params[f"b{i}"], 2, 1))
    src = _conv_ref(h, params["w_src"], None, 1, 1)
    cls = _conv_ref(h, params["w_cls"], None, 1, 0)
    return jnp.transpose(src, (0, 3, 1, 2)), cls[:, 0, 0, :]


# ------------------------------------------------------------------------- main

if __name__ == "__main__":
    key = jax.random.PRNGKey(0)
    k_params, k_x = jax.random.split(key)
    params = init_params(k_params)
    x = jax.random.normal(k_x, (2, 3, IMAGE_SIZE, IMAGE_SIZE), jnp.float32)

    out_src, out_cls = discriminator_forward(params, x)
    jax.block_until_ready((out_src, out_cls))

    patch = IMAGE_SIZE // (2 ** D_REPEAT_NUM)
    assert out_src.shape == (2, 1, patch, patch), out_src.shape
    assert out_cls.shape == (2, C_DIM), out_cls.shape

    ref_src, ref_cls = discriminator_ref(params, x)
    err_src = float(jnp.max(jnp.abs(out_src - ref_src)))
    err_cls = float(jnp.max(jnp.abs(out_cls - ref_cls)))
    assert err_src < 3e-2 and err_cls < 3e-2, (err_src, err_cls)

    print("KERNEL_OK")
</pallas_src>

<mosaic_0001>
module attributes {stable_mosaic.version = 11 : i64} {
  func.func @_conv_img_kernel(%arg0: i32, %arg1: memref<1x9x9x12xf32, #tpu.memory_space<vmem>>, %arg2: memref<2x2x12x8xbf16, #tpu.memory_space<vmem>>, %arg3: memref<1x8xf32, #tpu.memory_space<vmem>>, %arg4: memref<1x8x8x8xbf16, #tpu.memory_space<vmem>>) attributes {dimension_semantics = [#tpu.dimension_semantics<parallel>], iteration_bounds = array<i64: 2>, scalar_prefetch = 0 : i64, scratch_operands = 0 : i64, tpu.core_type = #tpu.core_type<tc>, window_params = [{transform_indices = @transform_0, window_bounds = array<i64: 1, 9, 9, 12>}, {pipeline_mode = #tpu.pipeline_mode<synchronous>, transform_indices = @transform_1, window_bounds = array<i64: 2, 2, 12, 8>}, {pipeline_mode = #tpu.pipeline_mode<synchronous>, transform_indices = @transform_2, window_bounds = array<i64: 1, 8>}, {transform_indices = @transform_3, window_bounds = array<i64: 1, 8, 8, 8>}]} {
    %c0 = arith.constant 0 : index
    %c0_0 = arith.constant 0 : index
    %c0_1 = arith.constant 0 : index
    %c0_2 = arith.constant 0 : index
    %0 = vector.load %arg1[%c0, %c0_0, %c0_1, %c0_2] : memref<1x9x9x12xf32, #tpu.memory_space<vmem>>, vector<1x9x9x12xf32>
    %1 = vector.shape_cast %0 : vector<1x9x9x12xf32> to vector<9x9x12xf32>
    %2 = arith.truncf %1 : vector<9x9x12xf32> to vector<9x9x12xbf16>
    %c0_3 = arith.constant 0 : index
    %c0_4 = arith.constant 0 : index
    %c0_5 = arith.constant 0 : index
    %c0_6 = arith.constant 0 : index
    %3 = vector.load %arg2[%c0_3, %c0_4, %c0_5, %c0_6] : memref<2x2x12x8xbf16, #tpu.memory_space<vmem>>, vector<1x1x12x8xbf16>
    %4 = vector.shape_cast %3 : vector<1x1x12x8xbf16> to vector<12x8xbf16>
    %c0_7 = arith.constant 0 : index
    %c1 = arith.constant 1 : index
    %c0_8 = arith.constant 0 : index
    %c0_9 = arith.constant 0 : index
    %5 = vector.load %arg2[%c0_7, %c1, %c0_8, %c0_9] : memref<2x2x12x8xbf16, #tpu.memory_space<vmem>>, vector<1x1x12x8xbf16>
    %6 = vector.shape_cast %5 : vector<1x1x12x8xbf16> to vector<12x8xbf16>
    %c1_10 = arith.constant 1 : index
    %c0_11 = arith.constant 0 : index
    %c0_12 = arith.constant 0 : index
    %c0_13 = arith.constant 0 : index
    %7 = vector.load %arg2[%c1_10, %c0_11, %c0_12, %c0_13] : memref<2x2x12x8xbf16, #tpu.memory_space<vmem>>, vector<1x1x12x8xbf16>
    %8 = vector.shape_cast %7 : vector<1x1x12x8xbf16> to vector<12x8xbf16>
    %c1_14 = arith.constant 1 : index
    %c1_15 = arith.constant 1 : index
    %c0_16 = arith.constant 0 : index
    %c0_17 = arith.constant 0 : index
    %9 = vector.load %arg2[%c1_14, %c1_15, %c0_16, %c0_17] : memref<2x2x12x8xbf16, #tpu.memory_space<vmem>>, vector<1x1x12x8xbf16>
    %10 = vector.shape_cast %9 : vector<1x1x12x8xbf16> to vector<12x8xbf16>
    %c0_18 = arith.constant 0 : index
    %c0_19 = arith.constant 0 : index
    %11 = vector.load %arg3[%c0_18, %c0_19] : memref<1x8xf32, #tpu.memory_space<vmem>>, vector<1x8xf32>
    %12 = vector.shape_cast %11 : vector<1x8xf32> to vector<1x8xf32>
    %13 = vector.broadcast %12 : vector<1x8xf32> to vector<8x8xf32>
    %14 = vector.extract_strided_slice %2 {offsets = [0, 0, 0], sizes = [1, 9, 12], strides = [1, 1, 1]} : vector<9x9x12xbf16> to vector<1x9x12xbf16>
    %15 = vector.shape_cast %14 : vector<1x9x12xbf16> to vector<9x12xbf16>
    %16 = vector.extract_strided_slice %15 {offsets = [0, 0], sizes = [8, 12], strides = [1, 1]} : vector<9x12xbf16> to vector<8x12xbf16>
    %cst = arith.constant dense<0.000000e+00> : vector<8x8xf32>
    %17 = tpu.matmul %16, %4, %cst {dimension_numbers = #tpu.dot_dimension_numbers<[1], [0], [0], [1], [0, 0, 1, 1], [], []>} : vector<8x12xbf16>, vector<12x8xbf16>, vector<8x8xf32> -> vector<8x8xf32>
    %18 = arith.addf %13, %17 : vector<8x8xf32>
    %19 = vector.extract_strided_slice %15 {offsets = [1, 0], sizes = [8, 12], strides = [1, 1]} : vector<9x12xbf16> to vector<8x12xbf16>
    %cst_20 = arith.constant dense<0.000000e+00> : vector<8x8xf32>
    %20 = tpu.matmul %19, %6, %cst_20 {dimension_numbers = #tpu.dot_dimension_numbers<[1], [0], [0], [1], [0, 0, 1, 1], [], []>} : vector<8x12xbf16>, vector<12x8xbf16>, vector<8x8xf32> -> vector<8x8xf32>
    %21 = arith.addf %18, %20 : vector<8x8xf32>
    %22 = vector.extract_strided_slice %2 {offsets = [1, 0, 0], sizes = [1, 9, 12], strides = [1, 1, 1]} : vector<9x9x12xbf16> to vector<1x9x12xbf16>
    %23 = vector.shape_cast %22 : vector<1x9x12xbf16> to vector<9x12xbf16>
    %24 = vector.extract_strided_slice %23 {offsets = [0, 0], sizes = [8, 12], strides = [1, 1]} : vector<9x12xbf16> to vector<8x12xbf16>
    %cst_21 = arith.constant dense<0.000000e+00> : vector<8x8xf32>
    %25 = tpu.matmul %24, %8, %cst_21 {dimension_numbers = #tpu.dot_dimension_numbers<[1], [0], [0], [1], [0, 0, 1, 1], [], []>} : vector<8x12xbf16>, vector<12x8xbf16>, vector<8x8xf32> -> vector<8x8xf32>
    %26 = arith.addf %21, %25 : vector<8x8xf32>
    %27 = vector.extract_strided_slice %23 {offsets = [1, 0], sizes = [8, 12], strides = [1, 1]} : vector<9x12xbf16> to vector<8x12xbf16>
    %cst_22 = arith.constant dense<0.000000e+00> : vector<8x8xf32>
    %28 = tpu.matmul %27, %10, %cst_22 {dimension_numbers = #tpu.dot_dimension_numbers<[1], [0], [0], [1], [0, 0, 1, 1], [], []>} : vector<8x12xbf16>, vector<12x8xbf16>, vector<8x8xf32> -> vector<8x8xf32>
    %29 = arith.addf %26, %28 : vector<8x8xf32>
    %cst_23 = arith.constant 0.000000e+00 : f32
    %30 = vector.broadcast %cst_23 : f32 to vector<8x8xf32>
    %31 = arith.cmpf oge, %29, %30 : vector<8x8xf32>
    %cst_24 = arith.constant 0.00999999977 : f32
    %32 = vector.broadcast %cst_24 : f32 to vector<8x8xf32>
    %33 = arith.mulf %32, %29 : vector<8x8xf32>
    %34 = arith.select %31, %29, %33 : vector<8x8xi1>, vector<8x8xf32>
    %35 = arith.truncf %34 : vector<8x8xf32> to vector<8x8xbf16>
    %c0_25 = arith.constant 0 : index
    %c0_26 = arith.constant 0 : index
    %c0_27 = arith.constant 0 : index
    %c0_28 = arith.constant 0 : index
    %36 = vector.load %arg4[%c0_25, %c0_26, %c0_27, %c0_28] : memref<1x8x8x8xbf16, #tpu.memory_space<vmem>>, vector<1x1x8x8xbf16>
    %37 = vector.shape_cast %36 : vector<1x1x8x8xbf16> to vector<8x8xbf16>
    %38 = vector.shape_cast %35 : vector<8x8xbf16> to vector<1x1x8x8xbf16>
    tpu.vector_store %arg4[%c0_25, %c0_26, %c0_27, %c0_28], %38 {strides = array<i32>} : memref<1x8x8x8xbf16, #tpu.memory_space<vmem>>, vector<1x1x8x8xbf16>,
    %39 = vector.extract_strided_slice %2 {offsets = [1, 0, 0], sizes = [1, 9, 12], strides = [1, 1, 1]} : vector<9x9x12xbf16> to vector<1x9x12xbf16>
    %40 = vector.shape_cast %39 : vector<1x9x12xbf16> to vector<9x12xbf16>
    %41 = vector.extract_strided_slice %40 {offsets = [0, 0], sizes = [8, 12], strides = [1, 1]} : vector<9x12xbf16> to vector<8x12xbf16>
    %cst_29 = arith.constant dense<0.000000e+00> : vector<8x8xf32>
    %42 = tpu.matmul %41, %4, %cst_29 {dimension_numbers = #tpu.dot_dimension_numbers<[1], [0], [0], [1], [0, 0, 1, 1], [], []>} : vector<8x12xbf16>, vector<12x8xbf16>, vector<8x8xf32> -> vector<8x8xf32>
    %43 = arith.addf %13, %42 : vector<8x8xf32>
    %44 = vector.extract_strided_slice %40 {offsets = [1, 0], sizes = [8, 12], strides = [1, 1]} : vector<9x12xbf16> to vector<8x12xbf16>
    %cst_30 = arith.constant dense<0.000000e+00> : vector<8x8xf32>
    %45 = tpu.matmul %44, %6, %cst_30 {dimension_numbers = #tpu.dot_dimension_numbers<[1], [0], [0], [1], [0, 0, 1, 1], [], []>} : vector<8x12xbf16>, vector<12x8xbf16>, vector<8x8xf32> -> vector<8x8xf32>
    %46 = arith.addf %43, %45 : vector<8x8xf32>
    %47 = vector.extract_strided_slice %2 {offsets = [2, 0, 0], sizes = [1, 9, 12], strides = [1, 1, 1]} : vector<9x9x12xbf16> to vector<1x9x12xbf16>
    %48 = vector.shape_cast %47 : vector<1x9x12xbf16> to vector<9x12xbf16>
    %49 = vector.extract_strided_slice %48 {offsets = [0, 0], sizes = [8, 12], strides = [1, 1]} : vector<9x12xbf16> to vector<8x12xbf16>
    %cst_31 = arith.constant dense<0.000000e+00> : vector<8x8xf32>
    %50 = tpu.matmul %49, %8, %cst_31 {dimension_numbers = #tpu.dot_dimension_numbers<[1], [0], [0], [1], [0, 0, 1, 1], [], []>} : vector<8x12xbf16>, vector<12x8xbf16>, vector<8x8xf32> -> vector<8x8xf32>
    %51 = arith.addf %46, %50 : vector<8x8xf32>
    %52 = vector.extract_strided_slice %48 {offsets = [1, 0], sizes = [8, 12], strides = [1, 1]} : vector<9x12xbf16> to vector<8x12xbf16>
    %cst_32 = arith.constant dense<0.000000e+00> : vector<8x8xf32>
    %53 = tpu.matmul %52, %10, %cst_32 {dimension_numbers = #tpu.dot_dimension_numbers<[1], [0], [0], [1], [0, 0, 1, 1], [], []>} : vector<8x12xbf16>, vector<12x8xbf16>, vector<8x8xf32> -> vector<8x8xf32>
    %54 = arith.addf %51, %53 : vector<8x8xf32>
    %cst_33 = arith.constant 0.000000e+00 : f32
    %55 = vector.broadcast %cst_33 : f32 to vector<8x8xf32>
    %56 = arith.cmpf oge, %54, %55 : vector<8x8xf32>
    %cst_34 = arith.constant 0.00999999977 : f32
    %57 = vector.broadcast %cst_34 : f32 to vector<8x8xf32>
    %58 = arith.mulf %57, %54 : vector<8x8xf32>
    %59 = arith.select %56, %54, %58 : vector<8x8xi1>, vector<8x8xf32>
    %60 = arith.truncf %59 : vector<8x8xf32> to vector<8x8xbf16>
    %c0_35 = arith.constant 0 : index
    %c1_36 = arith.constant 1 : index
    %c0_37 = arith.constant 0 : index
    %c0_38 = arith.constant 0 : index
    %61 = vector.load %arg4[%c0_35, %c1_36, %c0_37, %c0_38] : memref<1x8x8x8xbf16, #tpu.memory_space<vmem>>, vector<1x1x8x8xbf16>
    %62 = vector.shape_cast %61 : vector<1x1x8x8xbf16> to vector<8x8xbf16>
    %63 = vector.shape_cast %60 : vector<8x8xbf16> to vector<1x1x8x8xbf16>
    tpu.vector_store %arg4[%c0_35, %c1_36, %c0_37, %c0_38], %63 {strides = array<i32>} : memref<1x8x8x8xbf16, #tpu.memory_space<vmem>>, vector<1x1x8x8xbf16>,
    %64 = vector.extract_strided_slice %2 {offsets = [2, 0, 0], sizes = [1, 9, 12], strides = [1, 1, 1]} : vector<9x9x12xbf16> to vector<1x9x12xbf16>
    %65 = vector.shape_cast %64 : vector<1x9x12xbf16> to vector<9x12xbf16>
    %66 = vector.extract_strided_slice %65 {offsets = [0, 0], sizes = [8, 12], strides = [1, 1]} : vector<9x12xbf16> to vector<8x12xbf16>
    %cst_39 = arith.constant dense<0.000000e+00> : vector<8x8xf32>
    %67 = tpu.matmul %66, %4, %cst_39 {dimension_numbers = #tpu.dot_dimension_numbers<[1], [0], [0], [1], [0, 0, 1, 1], [], []>} : vector<8x12xbf16>, vector<12x8xbf16>, vector<8x8xf32> -> vector<8x8xf32>
    %68 = arith.addf %13, %67 : vector<8x8xf32>
    %69 = vector.extract_strided_slice %65 {offsets = [1, 0], sizes = [8, 12], strides = [1, 1]} : vector<9x12xbf16> to vector<8x12xbf16>
    %cst_40 = arith.constant dense<0.000000e+00> : vector<8x8xf32>
    %70 = tpu.matmul %69, %6, %cst_40 {dimension_numbers = #tpu.dot_dimension_numbers<[1], [0], [0], [1], [0, 0, 1, 1], [], []>} : vector<8x12xbf16>, vector<12x8xbf16>, vector<8x8xf32> -> vector<8x8xf32>
    %71 = arith.addf %68, %70 : vector<8x8xf32>
    %72 = vector.extract_strided_slice %2 {offsets = [3, 0, 0], sizes = [1, 9, 12], strides = [1, 1, 1]} : vector<9x9x12xbf16> to vector<1x9x12xbf16>
    %73 = vector.shape_cast %72 : vector<1x9x12xbf16> to vector<9x12xbf16>
    %74 = vector.extract_strided_slice %73 {offsets = [0, 0], sizes = [8, 12], strides = [1, 1]} : vector<9x12xbf16> to vector<8x12xbf16>
    %cst_41 = arith.constant dense<0.000000e+00> : vector<8x8xf32>
    %75 = tpu.matmul %74, %8, %cst_41 {dimension_numbers = #tpu.dot_dimension_numbers<[1], [0], [0], [1], [0, 0, 1, 1], [], []>} : vector<8x12xbf16>, vector<12x8xbf16>, vector<8x8xf32> -> vector<8x8xf32>
    %76 = arith.addf %71, %75 : vector<8x8xf32>
    %77 = vector.extract_strided_slice %73 {offsets = [1, 0], sizes = [8, 12], strides = [1, 1]} : vector<9x12xbf16> to vector<8x12xbf16>
    %cst_42 = arith.constant dense<0.000000e+00> : vector<8x8xf32>
    %78 = tpu.matmul %77, %10, %cst_42 {dimension_numbers = #tpu.dot_dimension_numbers<[1], [0], [0], [1], [0, 0, 1, 1], [], []>} : vector<8x12xbf16>, vector<12x8xbf16>, vector<8x8xf32> -> vector<8x8xf32>
    %79 = arith.addf %76, %78 : vector<8x8xf32>
    %cst_43 = arith.constant 0.000000e+00 : f32
    %80 = vector.broadcast %cst_43 : f32 to vector<8x8xf32>
    %81 = arith.cmpf oge, %79, %80 : vector<8x8xf32>
    %cst_44 = arith.constant 0.00999999977 : f32
    %82 = vector.broadcast %cst_44 : f32 to vector<8x8xf32>
    %83 = arith.mulf %82, %79 : vector<8x8xf32>
    %84 = arith.select %81, %79, %83 : vector<8x8xi1>, vector<8x8xf32>
    %85 = arith.truncf %84 : vector<8x8xf32> to vector<8x8xbf16>
    %c0_45 = arith.constant 0 : index
    %c2 = arith.constant 2 : index
    %c0_46 = arith.constant 0 : index
    %c0_47 = arith.constant 0 : index
    %86 = vector.load %arg4[%c0_45, %c2, %c0_46, %c0_47] : memref<1x8x8x8xbf16, #tpu.memory_space<vmem>>, vector<1x1x8x8xbf16>
    %87 = vector.shape_cast %86 : vector<1x1x8x8xbf16> to vector<8x8xbf16>
    %88 = vector.shape_cast %85 : vector<8x8xbf16> to vector<1x1x8x8xbf16>
    tpu.vector_store %arg4[%c0_45, %c2, %c0_46, %c0_47], %88 {strides = array<i32>} : memref<1x8x8x8xbf16, #tpu.memory_space<vmem>>, vector<1x1x8x8xbf16>,
    %89 = vector.extract_strided_slice %2 {offsets = [3, 0, 0], sizes = [1, 9, 12], strides = [1, 1, 1]} : vector<9x9x12xbf16> to vector<1x9x12xbf16>
    %90 = vector.shape_cast %89 : vector<1x9x12xbf16> to vector<9x12xbf16>
    %91 = vector.extract_strided_slice %90 {offsets = [0, 0], sizes = [8, 12], strides = [1, 1]} : vector<9x12xbf16> to vector<8x12xbf16>
    %cst_48 = arith.constant dense<0.000000e+00> : vector<8x8xf32>
    %92 = tpu.matmul %91, %4, %cst_48 {dimension_numbers = #tpu.dot_dimension_numbers<[1], [0], [0], [1], [0, 0, 1, 1], [], []>} : vector<8x12xbf16>, vector<12x8xbf16>, vector<8x8xf32> -> vector<8x8xf32>
    %93 = arith.addf %13, %92 : vector<8x8xf32>
    %94 = vector.extract_strided_slice %90 {offsets = [1, 0], sizes = [8, 12], strides = [1, 1]} : vector<9x12xbf16> to vector<8x12xbf16>
    %cst_49 = arith.constant dense<0.000000e+00> : vector<8x8xf32>
    %95 = tpu.matmul %94, %6, %cst_49 {dimension_numbers = #tpu.dot_dimension_numbers<[1], [0], [0], [1], [0, 0, 1, 1], [], []>} : vector<8x12xbf16>, vector<12x8xbf16>, vector<8x8xf32> -> vector<8x8xf32>
    %96 = arith.addf %93, %95 : vector<8x8xf32>
    %97 = vector.extract_strided_slice %2 {offsets = [4, 0, 0], sizes = [1, 9, 12], strides = [1, 1, 1]} : vector<9x9x12xbf16> to vector<1x9x12xbf16>
    %98 = vector.shape_cast %97 : vector<1x9x12xbf16> to vector<9x12xbf16>
    %99 = vector.extract_strided_slice %98 {offsets = [0, 0], sizes = [8, 12], strides = [1, 1]} : vector<9x12xbf16> to vector<8x12xbf16>
    %cst_50 = arith.constant dense<0.000000e+00> : vector<8x8xf32>
    %100 = tpu.matmul %99, %8, %cst_50 {dimension_numbers = #tpu.dot_dimension_numbers<[1], [0], [0], [1], [0, 0, 1, 1], [], []>} : vector<8x12xbf16>, vector<12x8xbf16>, vector<8x8xf32> -> vector<8x8xf32>
    %101 = arith.addf %96, %100 : vector<8x8xf32>
    %102 = vector.extract_strided_slice %98 {offsets = [1, 0], sizes = [8, 12], strides = [1, 1]} : vector<9x12xbf16> to vector<8x12xbf16>
    %cst_51 = arith.constant dense<0.000000e+00> : vector<8x8xf32>
    %103 = tpu.matmul %102, %10, %cst_51 {dimension_numbers = #tpu.dot_dimension_numbers<[1], [0], [0], [1], [0, 0, 1, 1], [], []>} : vector<8x12xbf16>, vector<12x8xbf16>, vector<8x8xf32> -> vector<8x8xf32>
    %104 = arith.addf %101, %103 : vector<8x8xf32>
    %cst_52 = arith.constant 0.000000e+00 : f32
    %105 = vector.broadcast %cst_52 : f32 to vector<8x8xf32>
    %106 = arith.cmpf oge, %104, %105 : vector<8x8xf32>
    %cst_53 = arith.constant 0.00999999977 : f32
    %107 = vector.broadcast %cst_53 : f32 to vector<8x8xf32>
    %108 = arith.mulf %107, %104 : vector<8x8xf32>
    %109 = arith.select %106, %104, %108 : vector<8x8xi1>, vector<8x8xf32>
    %110 = arith.truncf %109 : vector<8x8xf32> to vector<8x8xbf16>
    %c0_54 = arith.constant 0 : index
    %c3 = arith.constant 3 : index
    %c0_55 = arith.constant 0 : index
    %c0_56 = arith.constant 0 : index
    %111 = vector.load %arg4[%c0_54, %c3, %c0_55, %c0_56] : memref<1x8x8x8xbf16, #tpu.memory_space<vmem>>, vector<1x1x8x8xbf16>
    %112 = vector.shape_cast %111 : vector<1x1x8x8xbf16> to vector<8x8xbf16>
    %113 = vector.shape_cast %110 : vector<8x8xbf16> to vector<1x1x8x8xbf16>
    tpu.vector_store %arg4[%c0_54, %c3, %c0_55, %c0_56], %113 {strides = array<i32>} : memref<1x8x8x8xbf16, #tpu.memory_space<vmem>>, vector<1x1x8x8xbf16>,
    %114 = vector.extract_strided_slice %2 {offsets = [4, 0, 0], sizes = [1, 9, 12], strides = [1, 1, 1]} : vector<9x9x12xbf16> to vector<1x9x12xbf16>
    %115 = vector.shape_cast %114 : vector<1x9x12xbf16> to vector<9x12xbf16>
    %116 = vector.extract_strided_slice %115 {offsets = [0, 0], sizes = [8, 12], strides = [1, 1]} : vector<9x12xbf16> to vector<8x12xbf16>
    %cst_57 = arith.constant dense<0.000000e+00> : vector<8x8xf32>
    %117 = tpu.matmul %116, %4, %cst_57 {dimension_numbers = #tpu.dot_dimension_numbers<[1], [0], [0], [1], [0, 0, 1, 1], [], []>} : vector<8x12xbf16>, vector<12x8xbf16>, vector<8x8xf32> -> vector<8x8xf32>
    %118 = arith.addf %13, %117 : vector<8x8xf32>
    %119 = vector.extract_strided_slice %115 {offsets = [1, 0], sizes = [8, 12], strides = [1, 1]} : vector<9x12xbf16> to vector<8x12xbf16>
    %cst_58 = arith.constant dense<0.000000e+00> : vector<8x8xf32>
    %120 = tpu.matmul %119, %6, %cst_58 {dimension_numbers = #tpu.dot_dimension_numbers<[1], [0], [0], [1], [0, 0, 1, 1], [], []>} : vector<8x12xbf16>, vector<12x8xbf16>, vector<8x8xf32> -> vector<8x8xf32>
    %121 = arith.addf %118, %120 : vector<8x8xf32>
    %122 = vector.extract_strided_slice %2 {offsets = [5, 0, 0], sizes = [1, 9, 12], strides = [1, 1, 1]} : vector<9x9x12xbf16> to vector<1x9x12xbf16>
    %123 = vector.shape_cast %122 : vector<1x9x12xbf16> to vector<9x12xbf16>
    %124 = vector.extract_strided_slice %123 {offsets = [0, 0], sizes = [8, 12], strides = [1, 1]} : vector<9x12xbf16> to vector<8x12xbf16>
    %cst_59 = arith.constant dense<0.000000e+00> : vector<8x8xf32>
    %125 = tpu.matmul %124, %8, %cst_59 {dimension_numbers = #tpu.dot_dimension_numbers<[1], [0], [0], [1], [0, 0, 1, 1], [], []>} : vector<8x12xbf16>, vector<12x8xbf16>, vector<8x8xf32> -> vector<8x8xf32>
    %126 = arith.addf %121, %125 : vector<8x8xf32>
    %127 = vector.extract_strided_slice %123 {offsets = [1, 0], sizes = [8, 12], strides = [1, 1]} : vector<9x12xbf16> to vector<8x12xbf16>
    %cst_60 = arith.constant dense<0.000000e+00> : vector<8x8xf32>
    %128 = tpu.matmul %127, %10, %cst_60 {dimension_numbers = #tpu.dot_dimension_numbers<[1], [0], [0], [1], [0, 0, 1, 1], [], []>} : vector<8x12xbf16>, vector<12x8xbf16>, vector<8x8xf32> -> vector<8x8xf32>
    %129 = arith.addf %126, %128 : vector<8x8xf32>
    %cst_61 = arith.constant 0.000000e+00 : f32
    %130 = vector.broadcast %cst_61 : f32 to vector<8x8xf32>
    %131 = arith.cmpf oge, %129, %130 : vector<8x8xf32>
    %cst_62 = arith.constant 0.00999999977 : f32
    %132 = vector.broadcast %cst_62 : f32 to vector<8x8xf32>
    %133 = arith.mulf %132, %129 : vector<8x8xf32>
    %134 = arith.select %131, %129, %133 : vector<8x8xi1>, vector<8x8xf32>
    %135 = arith.truncf %134 : vector<8x8xf32> to vector<8x8xbf16>
    %c0_63 = arith.constant 0 : index
    %c4 = arith.constant 4 : index
    %c0_64 = arith.constant 0 : index
    %c0_65 = arith.constant 0 : index
    %136 = vector.load %arg4[%c0_63, %c4, %c0_64, %c0_65] : memref<1x8x8x8xbf16, #tpu.memory_space<vmem>>, vector<1x1x8x8xbf16>
    %137 = vector.shape_cast %136 : vector<1x1x8x8xbf16> to vector<8x8xbf16>
    %138 = vector.shape_cast %135 : vector<8x8xbf16> to vector<1x1x8x8xbf16>
    tpu.vector_store %arg4[%c0_63, %c4, %c0_64, %c0_65], %138 {strides = array<i32>} : memref<1x8x8x8xbf16, #tpu.memory_space<vmem>>, vector<1x1x8x8xbf16>,
    %139 = vector.extract_strided_slice %2 {offsets = [5, 0, 0], sizes = [1, 9, 12], strides = [1, 1, 1]} : vector<9x9x12xbf16> to vector<1x9x12xbf16>
    %140 = vector.shape_cast %139 : vector<1x9x12xbf16> to vector<9x12xbf16>
    %141 = vector.extract_strided_slice %140 {offsets = [0, 0], sizes = [8, 12], strides = [1, 1]} : vector<9x12xbf16> to vector<8x12xbf16>
    %cst_66 = arith.constant dense<0.000000e+00> : vector<8x8xf32>
    %142 = tpu.matmul %141, %4, %cst_66 {dimension_numbers = #tpu.dot_dimension_numbers<[1], [0], [0], [1], [0, 0, 1, 1], [], []>} : vector<8x12xbf16>, vector<12x8xbf16>, vector<8x8xf32> -> vector<8x8xf32>
    %143 = arith.addf %13, %142 : vector<8x8xf32>
    %144 = vector.extract_strided_slice %140 {offsets = [1, 0], sizes = [8, 12], strides = [1, 1]} : vector<9x12xbf16> to vector<8x12xbf16>
    %cst_67 = arith.constant dense<0.000000e+00> : vector<8x8xf32>
    %145 = tpu.matmul %144, %6, %cst_67 {dimension_numbers = #tpu.dot_dimension_numbers<[1], [0], [0], [1], [0, 0, 1, 1], [], []>} : vector<8x12xbf16>, vector<12x8xbf16>, vector<8x8xf32> -> vector<8x8xf32>
    %146 = arith.addf %143, %145 : vector<8x8xf32>
    %147 = vector.extract_strided_slice %2 {offsets = [6, 0, 0], sizes = [1, 9, 12], strides = [1, 1, 1]} : vector<9x9x12xbf16> to vector<1x9x12xbf16>
    %148 = vector.shape_cast %147 : vector<1x9x12xbf16> to vector<9x12xbf16>
    %149 = vector.extract_strided_slice %148 {offsets = [0, 0], sizes = [8, 12], strides = [1, 1]} : vector<9x12xbf16> to vector<8x12xbf16>
    %cst_68 = arith.constant dense<0.000000e+00> : vector<8x8xf32>
    %150 = tpu.matmul %149, %8, %cst_68 {dimension_numbers = #tpu.dot_dimension_numbers<[1], [0], [0], [1], [0, 0, 1, 1], [], []>} : vector<8x12xbf16>, vector<12x8xbf16>, vector<8x8xf32> -> vector<8x8xf32>
    %151 = arith.addf %146, %150 : vector<8x8xf32>
    %152 = vector.extract_strided_slice %148 {offsets = [1, 0], sizes = [8, 12], strides = [1, 1]} : vector<9x12xbf16> to vector<8x12xbf16>
    %cst_69 = arith.constant dense<0.000000e+00> : vector<8x8xf32>
    %153 = tpu.matmul %152, %10, %cst_69 {dimension_numbers = #tpu.dot_dimension_numbers<[1], [0], [0], [1], [0, 0, 1, 1], [], []>} : vector<8x12xbf16>, vector<12x8xbf16>, vector<8x8xf32> -> vector<8x8xf32>
    %154 = arith.addf %151, %153 : vector<8x8xf32>
    %cst_70 = arith.constant 0.000000e+00 : f32
    %155 = vector.broadcast %cst_70 : f32 to vector<8x8xf32>
    %156 = arith.cmpf oge, %154, %155 : vector<8x8xf32>
    %cst_71 = arith.constant 0.00999999977 : f32
    %157 = vector.broadcast %cst_71 : f32 to vector<8x8xf32>
    %158 = arith.mulf %157, %154 : vector<8x8xf32>
    %159 = arith.select %156, %154, %158 : vector<8x8xi1>, vector<8x8xf32>
    %160 = arith.truncf %159 : vector<8x8xf32> to vector<8x8xbf16>
    %c0_72 = arith.constant 0 : index
    %c5 = arith.constant 5 : index
    %c0_73 = arith.constant 0 : index
    %c0_74 = arith.constant 0 : index
    %161 = vector.load %arg4[%c0_72, %c5, %c0_73, %c0_74] : memref<1x8x8x8xbf16, #tpu.memory_space<vmem>>, vector<1x1x8x8xbf16>
    %162 = vector.shape_cast %161 : vector<1x1x8x8xbf16> to vector<8x8xbf16>
    %163 = vector.shape_cast %160 : vector<8x8xbf16> to vector<1x1x8x8xbf16>
    tpu.vector_store %arg4[%c0_72, %c5, %c0_73, %c0_74], %163 {strides = array<i32>} : memref<1x8x8x8xbf16, #tpu.memory_space<vmem>>, vector<1x1x8x8xbf16>,
    %164 = vector.extract_strided_slice %2 {offsets = [6, 0, 0], sizes = [1, 9, 12], strides = [1, 1, 1]} : vector<9x9x12xbf16> to vector<1x9x12xbf16>
    %165 = vector.shape_cast %164 : vector<1x9x12xbf16> to vector<9x12xbf16>
    %166 = vector.extract_strided_slice %165 {offsets = [0, 0], sizes = [8, 12], strides = [1, 1]} : vector<9x12xbf16> to vector<8x12xbf16>
    %cst_75 = arith.constant dense<0.000000e+00> : vector<8x8xf32>
    %167 = tpu.matmul %166, %4, %cst_75 {dimension_numbers = #tpu.dot_dimension_numbers<[1], [0], [0], [1], [0, 0, 1, 1], [], []>} : vector<8x12xbf16>, vector<12x8xbf16>, vector<8x8xf32> -> vector<8x8xf32>
    %168 = arith.addf %13, %167 : vector<8x8xf32>
    %169 = vector.extract_strided_slice %165 {offsets = [1, 0], sizes = [8, 12], strides = [1, 1]} : vector<9x12xbf16> to vector<8x12xbf16>
    %cst_76 = arith.constant dense<0.000000e+00> : vector<8x8xf32>
    %170 = tpu.matmul %169, %6, %cst_76 {dimension_numbers = #tpu.dot_dimension_numbers<[1], [0], [0], [1], [0, 0, 1, 1], [], []>} : vector<8x12xbf16>, vector<12x8xbf16>, vector<8x8xf32> -> vector<8x8xf32>
    %171 = arith.addf %168, %170 : vector<8x8xf32>
    %172 = vector.extract_strided_slice %2 {offsets = [7, 0, 0], sizes = [1, 9, 12], strides = [1, 1, 1]} : vector<9x9x12xbf16> to vector<1x9x12xbf16>
    %173 = vector.shape_cast %172 : vector<1x9x12xbf16> to vector<9x12xbf16>
    %174 = vector.extract_strided_slice %173 {offsets = [0, 0], sizes = [8, 12], strides = [1, 1]} : vector<9x12xbf16> to vector<8x12xbf16>
    %cst_77 = arith.constant dense<0.000000e+00> : vector<8x8xf32>
    %175 = tpu.matmul %174, %8, %cst_77 {dimension_numbers = #tpu.dot_dimension_numbers<[1], [0], [0], [1], [0, 0, 1, 1], [], []>} : vector<8x12xbf16>, vector<12x8xbf16>, vector<8x8xf32> -> vector<8x8xf32>
    %176 = arith.addf %171, %175 : vector<8x8xf32>
    %177 = vector.extract_strided_slice %173 {offsets = [1, 0], sizes = [8, 12], strides = [1, 1]} : vector<9x12xbf16> to vector<8x12xbf16>
    %cst_78 = arith.constant dense<0.000000e+00> : vector<8x8xf32>
    %178 = tpu.matmul %177, %10, %cst_78 {dimension_numbers = #tpu.dot_dimension_numbers<[1], [0], [0], [1], [0, 0, 1, 1], [], []>} : vector<8x12xbf16>, vector<12x8xbf16>, vector<8x8xf32> -> vector<8x8xf32>
    %179 = arith.addf %176, %178 : vector<8x8xf32>
    %cst_79 = arith.constant 0.000000e+00 : f32
    %180 = vector.broadcast %cst_79 : f32 to vector<8x8xf32>
    %181 = arith.cmpf oge, %179, %180 : vector<8x8xf32>
    %cst_80 = arith.constant 0.00999999977 : f32
    %182 = vector.broadcast %cst_80 : f32 to vector<8x8xf32>
    %183 = arith.mulf %182, %179 : vector<8x8xf32>
    %184 = arith.select %181, %179, %183 : vector<8x8xi1>, vector<8x8xf32>
    %185 = arith.truncf %184 : vector<8x8xf32> to vector<8x8xbf16>
    %c0_81 = arith.constant 0 : index
    %c6 = arith.constant 6 : index
    %c0_82 = arith.constant 0 : index
    %c0_83 = arith.constant 0 : index
    %186 = vector.load %arg4[%c0_81, %c6, %c0_82, %c0_83] : memref<1x8x8x8xbf16, #tpu.memory_space<vmem>>, vector<1x1x8x8xbf16>
    %187 = vector.shape_cast %186 : vector<1x1x8x8xbf16> to vector<8x8xbf16>
    %188 = vector.shape_cast %185 : vector<8x8xbf16> to vector<1x1x8x8xbf16>
    tpu.vector_store %arg4[%c0_81, %c6, %c0_82, %c0_83], %188 {strides = array<i32>} : memref<1x8x8x8xbf16, #tpu.memory_space<vmem>>, vector<1x1x8x8xbf16>,
    %189 = vector.extract_strided_slice %2 {offsets = [7, 0, 0], sizes = [1, 9, 12], strides = [1, 1, 1]} : vector<9x9x12xbf16> to vector<1x9x12xbf16>
    %190 = vector.shape_cast %189 : vector<1x9x12xbf16> to vector<9x12xbf16>
    %191 = vector.extract_strided_slice %190 {offsets = [0, 0], sizes = [8, 12], strides = [1, 1]} : vector<9x12xbf16> to vector<8x12xbf16>
    %cst_84 = arith.constant dense<0.000000e+00> : vector<8x8xf32>
    %192 = tpu.matmul %191, %4, %cst_84 {dimension_numbers = #tpu.dot_dimension_numbers<[1], [0], [0], [1], [0, 0, 1, 1], [], []>} : vector<8x12xbf16>, vector<12x8xbf16>, vector<8x8xf32> -> vector<8x8xf32>
    %193 = arith.addf %13, %192 : vector<8x8xf32>
    %194 = vector.extract_strided_slice %190 {offsets = [1, 0], sizes = [8, 12], strides = [1, 1]} : vector<9x12xbf16> to vector<8x12xbf16>
    %cst_85 = arith.constant dense<0.000000e+00> : vector<8x8xf32>
    %195 = tpu.matmul %194, %6, %cst_85 {dimension_numbers = #tpu.dot_dimension_numbers<[1], [0], [0], [1], [0, 0, 1, 1], [], []>} : vector<8x12xbf16>, vector<12x8xbf16>, vector<8x8xf32> -> vector<8x8xf32>
    %196 = arith.addf %193, %195 : vector<8x8xf32>
    %197 = vector.extract_strided_slice %2 {offsets = [8, 0, 0], sizes = [1, 9, 12], strides = [1, 1, 1]} : vector<9x9x12xbf16> to vector<1x9x12xbf16>
    %198 = vector.shape_cast %197 : vector<1x9x12xbf16> to vector<9x12xbf16>
    %199 = vector.extract_strided_slice %198 {offsets = [0, 0], sizes = [8, 12], strides = [1, 1]} : vector<9x12xbf16> to vector<8x12xbf16>
    %cst_86 = arith.constant dense<0.000000e+00> : vector<8x8xf32>
    %200 = tpu.matmul %199, %8, %cst_86 {dimension_numbers = #tpu.dot_dimension_numbers<[1], [0], [0], [1], [0, 0, 1, 1], [], []>} : vector<8x12xbf16>, vector<12x8xbf16>, vector<8x8xf32> -> vector<8x8xf32>
    %201 = arith.addf %196, %200 : vector<8x8xf32>
    %202 = vector.extract_strided_slice %198 {offsets = [1, 0], sizes = [8, 12], strides = [1, 1]} : vector<9x12xbf16> to vector<8x12xbf16>
    %cst_87 = arith.constant dense<0.000000e+00> : vector<8x8xf32>
    %203 = tpu.matmul %202, %10, %cst_87 {dimension_numbers = #tpu.dot_dimension_numbers<[1], [0], [0], [1], [0, 0, 1, 1], [], []>} : vector<8x12xbf16>, vector<12x8xbf16>, vector<8x8xf32> -> vector<8x8xf32>
    %204 = arith.addf %201, %203 : vector<8x8xf32>
    %cst_88 = arith.constant 0.000000e+00 : f32
    %205 = vector.broadcast %cst_88 : f32 to vector<8x8xf32>
    %206 = arith.cmpf oge, %204, %205 : vector<8x8xf32>
    %cst_89 = arith.constant 0.00999999977 : f32
    %207 = vector.broadcast %cst_89 : f32 to vector<8x8xf32>
    %208 = arith.mulf %207, %204 : vector<8x8xf32>
    %209 = arith.select %206, %204, %208 : vector<8x8xi1>, vector<8x8xf32>
    %210 = arith.truncf %209 : vector<8x8xf32> to vector<8x8xbf16>
    %c0_90 = arith.constant 0 : index
    %c7 = arith.constant 7 : index
    %c0_91 = arith.constant 0 : index
    %c0_92 = arith.constant 0 : index
    %211 = vector.load %arg4[%c0_90, %c7, %c0_91, %c0_92] : memref<1x8x8x8xbf16, #tpu.memory_space<vmem>>, vector<1x1x8x8xbf16>
    %212 = vector.shape_cast %211 : vector<1x1x8x8xbf16> to vector<8x8xbf16>
    %213 = vector.shape_cast %210 : vector<8x8xbf16> to vector<1x1x8x8xbf16>
    tpu.vector_store %arg4[%c0_90, %c7, %c0_91, %c0_92], %213 {strides = array<i32>} : memref<1x8x8x8xbf16, #tpu.memory_space<vmem>>, vector<1x1x8x8xbf16>,
    return
  }
  func.func @transform_0(%arg0: i32) -> (i32, i32, i32, i32) {
    %c0_i32 = arith.constant 0 : i32
    %c0_i32_0 = arith.constant 0 : i32
    %c0_i32_1 = arith.constant 0 : i32
    %c0_i32_2 = arith.constant 0 : i32
    return %arg0, %c0_i32, %c0_i32_0, %c0_i32_1 : i32, i32, i32, i32
  }
  func.func @transform_1(%arg0: i32) -> (i32, i32, i32, i32) {
    %c0_i32 = arith.constant 0 : i32
    %c0_i32_0 = arith.constant 0 : i32
    %c0_i32_1 = arith.constant 0 : i32
    %c0_i32_2 = arith.constant 0 : i32
    %c0_i32_3 = arith.constant 0 : i32
    return %c0_i32, %c0_i32_0, %c0_i32_1, %c0_i32_2 : i32, i32, i32, i32
  }
  func.func @transform_2(%arg0: i32) -> (i32, i32) {
    %c0_i32 = arith.constant 0 : i32
    %c0_i32_0 = arith.constant 0 : i32
    %c0_i32_1 = arith.constant 0 : i32
    return %c0_i32, %c0_i32_0 : i32, i32
  }
  func.func @transform_3(%arg0: i32) -> (i32, i32, i32, i32) {
    %c0_i32 = arith.constant 0 : i32
    %c0_i32_0 = arith.constant 0 : i32
    %c0_i32_1 = arith.constant 0 : i32
    %c0_i32_2 = arith.constant 0 : i32
    return %arg0, %c0_i32, %c0_i32_0, %c0_i32_1 : i32, i32, i32, i32
  }
}

module attributes {stable_mosaic.version = 11 : i64} {
  func.func @_conv_img_kernel(%arg0: i32, %arg1: memref<1x5x5x32xbf16, #tpu.memory_space<vmem>>, %arg2: memref<2x2x32x16xbf16, #tpu.memory_space<vmem>>, %arg3: memref<1x16xf32, #tpu.memory_space<vmem>>, %arg4: memref<1x4x4x16xbf16, #tpu.memory_space<vmem>>) attributes {dimension_semantics = [#tpu.dimension_semantics<parallel>], iteration_bounds = array<i64: 2>, scalar_prefetch = 0 : i64, scratch_operands = 0 : i64, tpu.core_type = #tpu.core_type<tc>, window_params = [{transform_indices = @transform_0, window_bounds = array<i64: 1, 5, 5, 32>}, {pipeline_mode = #tpu.pipeline_mode<synchronous>, transform_indices = @transform_1, window_bounds = array<i64: 2, 2, 32, 16>}, {pipeline_mode = #tpu.pipeline_mode<synchronous>, transform_indices = @transform_2, window_bounds = array<i64: 1, 16>}, {transform_indices = @transform_3, window_bounds = array<i64: 1, 4, 4, 16>}]} {
    %c0 = arith.constant 0 : index
    %c0_0 = arith.constant 0 : index
    %c0_1 = arith.constant 0 : index
    %c0_2 = arith.constant 0 : index
    %0 = vector.load %arg1[%c0, %c0_0, %c0_1, %c0_2] : memref<1x5x5x32xbf16, #tpu.memory_space<vmem>>, vector<1x5x5x32xbf16>
    %1 = vector.shape_cast %0 : vector<1x5x5x32xbf16> to vector<5x5x32xbf16>
    %c0_3 = arith.constant 0 : index
    %c0_4 = arith.constant 0 : index
    %c0_5 = arith.constant 0 : index
    %c0_6 = arith.constant 0 : index
    %2 = vector.load %arg2[%c0_3, %c0_4, %c0_5, %c0_6] : memref<2x2x32x16xbf16, #tpu.memory_space<vmem>>, vector<1x1x32x16xbf16>
    %3 = vector.shape_cast %2 : vector<1x1x32x16xbf16> to vector<32x16xbf16>
    %c0_7 = arith.constant 0 : index
    %c1 = arith.constant 1 : index
    %c0_8 = arith.constant 0 : index
    %c0_9 = arith.constant 0 : index
    %4 = vector.load %arg2[%c0_7, %c1, %c0_8, %c0_9] : memref<2x2x32x16xbf16, #tpu.memory_space<vmem>>, vector<1x1x32x16xbf16>
    %5 = vector.shape_cast %4 : vector<1x1x32x16xbf16> to vector<32x16xbf16>
    %c1_10 = arith.constant 1 : index
    %c0_11 = arith.constant 0 : index
    %c0_12 = arith.constant 0 : index
    %c0_13 = arith.constant 0 : index
    %6 = vector.load %arg2[%c1_10, %c0_11, %c0_12, %c0_13] : memref<2x2x32x16xbf16, #tpu.memory_space<vmem>>, vector<1x1x32x16xbf16>
    %7 = vector.shape_cast %6 : vector<1x1x32x16xbf16> to vector<32x16xbf16>
    %c1_14 = arith.constant 1 : index
    %c1_15 = arith.constant 1 : index
    %c0_16 = arith.constant 0 : index
    %c0_17 = arith.constant 0 : index
    %8 = vector.load %arg2[%c1_14, %c1_15, %c0_16, %c0_17] : memref<2x2x32x16xbf16, #tpu.memory_space<vmem>>, vector<1x1x32x16xbf16>
    %9 = vector.shape_cast %8 : vector<1x1x32x16xbf16> to vector<32x16xbf16>
    %c0_18 = arith.constant 0 : index
    %c0_19 = arith.constant 0 : index
    %10 = vector.load %arg3[%c0_18, %c0_19] : memref<1x16xf32, #tpu.memory_space<vmem>>, vector<1x16xf32>
    %11 = vector.shape_cast %10 : vector<1x16xf32> to vector<1x16xf32>
    %12 = vector.broadcast %11 : vector<1x16xf32> to vector<4x16xf32>
    %13 = vector.extract_strided_slice %1 {offsets = [0, 0, 0], sizes = [1, 5, 32], strides = [1, 1, 1]} : vector<5x5x32xbf16> to vector<1x5x32xbf16>
    %14 = vector.shape_cast %13 : vector<1x5x32xbf16> to vector<5x32xbf16>
    %15 = vector.extract_strided_slice %14 {offsets = [0, 0], sizes = [4, 32], strides = [1, 1]} : vector<5x32xbf16> to vector<4x32xbf16>
    %cst = arith.constant dense<0.000000e+00> : vector<4x16xf32>
    %16 = tpu.matmul %15, %3, %cst {dimension_numbers = #tpu.dot_dimension_numbers<[1], [0], [0], [1], [0, 0, 1, 1], [], []>} : vector<4x32xbf16>, vector<32x16xbf16>, vector<4x16xf32> -> vector<4x16xf32>
    %17 = arith.addf %12, %16 : vector<4x16xf32>
    %18 = vector.extract_strided_slice %14 {offsets = [1, 0], sizes = [4, 32], strides = [1, 1]} : vector<5x32xbf16> to vector<4x32xbf16>
    %cst_20 = arith.constant dense<0.000000e+00> : vector<4x16xf32>
    %19 = tpu.matmul %18, %5, %cst_20 {dimension_numbers = #tpu.dot_dimension_numbers<[1], [0], [0], [1], [0, 0, 1, 1], [], []>} : vector<4x32xbf16>, vector<32x16xbf16>, vector<4x16xf32> -> vector<4x16xf32>
    %20 = arith.addf %17, %19 : vector<4x16xf32>
    %21 = vector.extract_strided_slice %1 {offsets = [1, 0, 0], sizes = [1, 5, 32], strides = [1, 1, 1]} : vector<5x5x32xbf16> to vector<1x5x32xbf16>
    %22 = vector.shape_cast %21 : vector<1x5x32xbf16> to vector<5x32xbf16>
    %23 = vector.extract_strided_slice %22 {offsets = [0, 0], sizes = [4, 32], strides = [1, 1]} : vector<5x32xbf16> to vector<4x32xbf16>
    %cst_21 = arith.constant dense<0.000000e+00> : vector<4x16xf32>
    %24 = tpu.matmul %23, %7, %cst_21 {dimension_numbers = #tpu.dot_dimension_numbers<[1], [0], [0], [1], [0, 0, 1, 1], [], []>} : vector<4x32xbf16>, vector<32x16xbf16>, vector<4x16xf32> -> vector<4x16xf32>
    %25 = arith.addf %20, %24 : vector<4x16xf32>
    %26 = vector.extract_strided_slice %22 {offsets = [1, 0], sizes = [4, 32], strides = [1, 1]} : vector<5x32xbf16> to vector<4x32xbf16>
    %cst_22 = arith.constant dense<0.000000e+00> : vector<4x16xf32>
    %27 = tpu.matmul %26, %9, %cst_22 {dimension_numbers = #tpu.dot_dimension_numbers<[1], [0], [0], [1], [0, 0, 1, 1], [], []>} : vector<4x32xbf16>, vector<32x16xbf16>, vector<4x16xf32> -> vector<4x16xf32>
    %28 = arith.addf %25, %27 : vector<4x16xf32>
    %cst_23 = arith.constant 0.000000e+00 : f32
    %29 = vector.broadcast %cst_23 : f32 to vector<4x16xf32>
    %30 = arith.cmpf oge, %28, %29 : vector<4x16xf32>
    %cst_24 = arith.constant 0.00999999977 : f32
    %31 = vector.broadcast %cst_24 : f32 to vector<4x16xf32>
    %32 = arith.mulf %31, %28 : vector<4x16xf32>
    %33 = arith.select %30, %28, %32 : vector<4x16xi1>, vector<4x16xf32>
    %34 = arith.truncf %33 : vector<4x16xf32> to vector<4x16xbf16>
    %c0_25 = arith.constant 0 : index
    %c0_26 = arith.constant 0 : index
    %c0_27 = arith.constant 0 : index
    %c0_28 = arith.constant 0 : index
    %35 = vector.load %arg4[%c0_25, %c0_26, %c0_27, %c0_28] : memref<1x4x4x16xbf16, #tpu.memory_space<vmem>>, vector<1x1x4x16xbf16>
    %36 = vector.shape_cast %35 : vector<1x1x4x16xbf16> to vector<4x16xbf16>
    %37 = vector.shape_cast %34 : vector<4x16xbf16> to vector<1x1x4x16xbf16>
    tpu.vector_store %arg4[%c0_25, %c0_26, %c0_27, %c0_28], %37 {strides = array<i32>} : memref<1x4x4x16xbf16, #tpu.memory_space<vmem>>, vector<1x1x4x16xbf16>,
    %38 = vector.extract_strided_slice %1 {offsets = [1, 0, 0], sizes = [1, 5, 32], strides = [1, 1, 1]} : vector<5x5x32xbf16> to vector<1x5x32xbf16>
    %39 = vector.shape_cast %38 : vector<1x5x32xbf16> to vector<5x32xbf16>
    %40 = vector.extract_strided_slice %39 {offsets = [0, 0], sizes = [4, 32], strides = [1, 1]} : vector<5x32xbf16> to vector<4x32xbf16>
    %cst_29 = arith.constant dense<0.000000e+00> : vector<4x16xf32>
    %41 = tpu.matmul %40, %3, %cst_29 {dimension_numbers = #tpu.dot_dimension_numbers<[1], [0], [0], [1], [0, 0, 1, 1], [], []>} : vector<4x32xbf16>, vector<32x16xbf16>, vector<4x16xf32> -> vector<4x16xf32>
    %42 = arith.addf %12, %41 : vector<4x16xf32>
    %43 = vector.extract_strided_slice %39 {offsets = [1, 0], sizes = [4, 32], strides = [1, 1]} : vector<5x32xbf16> to vector<4x32xbf16>
    %cst_30 = arith.constant dense<0.000000e+00> : vector<4x16xf32>
    %44 = tpu.matmul %43, %5, %cst_30 {dimension_numbers = #tpu.dot_dimension_numbers<[1], [0], [0], [1], [0, 0, 1, 1], [], []>} : vector<4x32xbf16>, vector<32x16xbf16>, vector<4x16xf32> -> vector<4x16xf32>
    %45 = arith.addf %42, %44 : vector<4x16xf32>
    %46 = vector.extract_strided_slice %1 {offsets = [2, 0, 0], sizes = [1, 5, 32], strides = [1, 1, 1]} : vector<5x5x32xbf16> to vector<1x5x32xbf16>
    %47 = vector.shape_cast %46 : vector<1x5x32xbf16> to vector<5x32xbf16>
    %48 = vector.extract_strided_slice %47 {offsets = [0, 0], sizes = [4, 32], strides = [1, 1]} : vector<5x32xbf16> to vector<4x32xbf16>
    %cst_31 = arith.constant dense<0.000000e+00> : vector<4x16xf32>
    %49 = tpu.matmul %48, %7, %cst_31 {dimension_numbers = #tpu.dot_dimension_numbers<[1], [0], [0], [1], [0, 0, 1, 1], [], []>} : vector<4x32xbf16>, vector<32x16xbf16>, vector<4x16xf32> -> vector<4x16xf32>
    %50 = arith.addf %45, %49 : vector<4x16xf32>
    %51 = vector.extract_strided_slice %47 {offsets = [1, 0], sizes = [4, 32], strides = [1, 1]} : vector<5x32xbf16> to vector<4x32xbf16>
    %cst_32 = arith.constant dense<0.000000e+00> : vector<4x16xf32>
    %52 = tpu.matmul %51, %9, %cst_32 {dimension_numbers = #tpu.dot_dimension_numbers<[1], [0], [0], [1], [0, 0, 1, 1], [], []>} : vector<4x32xbf16>, vector<32x16xbf16>, vector<4x16xf32> -> vector<4x16xf32>
    %53 = arith.addf %50, %52 : vector<4x16xf32>
    %cst_33 = arith.constant 0.000000e+00 : f32
    %54 = vector.broadcast %cst_33 : f32 to vector<4x16xf32>
    %55 = arith.cmpf oge, %53, %54 : vector<4x16xf32>
    %cst_34 = arith.constant 0.00999999977 : f32
    %56 = vector.broadcast %cst_34 : f32 to vector<4x16xf32>
    %57 = arith.mulf %56, %53 : vector<4x16xf32>
    %58 = arith.select %55, %53, %57 : vector<4x16xi1>, vector<4x16xf32>
    %59 = arith.truncf %58 : vector<4x16xf32> to vector<4x16xbf16>
    %c0_35 = arith.constant 0 : index
    %c1_36 = arith.constant 1 : index
    %c0_37 = arith.constant 0 : index
    %c0_38 = arith.constant 0 : index
    %60 = vector.load %arg4[%c0_35, %c1_36, %c0_37, %c0_38] : memref<1x4x4x16xbf16, #tpu.memory_space<vmem>>, vector<1x1x4x16xbf16>
    %61 = vector.shape_cast %60 : vector<1x1x4x16xbf16> to vector<4x16xbf16>
    %62 = vector.shape_cast %59 : vector<4x16xbf16> to vector<1x1x4x16xbf16>
    tpu.vector_store %arg4[%c0_35, %c1_36, %c0_37, %c0_38], %62 {strides = array<i32>} : memref<1x4x4x16xbf16, #tpu.memory_space<vmem>>, vector<1x1x4x16xbf16>,
    %63 = vector.extract_strided_slice %1 {offsets = [2, 0, 0], sizes = [1, 5, 32], strides = [1, 1, 1]} : vector<5x5x32xbf16> to vector<1x5x32xbf16>
    %64 = vector.shape_cast %63 : vector<1x5x32xbf16> to vector<5x32xbf16>
    %65 = vector.extract_strided_slice %64 {offsets = [0, 0], sizes = [4, 32], strides = [1, 1]} : vector<5x32xbf16> to vector<4x32xbf16>
    %cst_39 = arith.constant dense<0.000000e+00> : vector<4x16xf32>
    %66 = tpu.matmul %65, %3, %cst_39 {dimension_numbers = #tpu.dot_dimension_numbers<[1], [0], [0], [1], [0, 0, 1, 1], [], []>} : vector<4x32xbf16>, vector<32x16xbf16>, vector<4x16xf32> -> vector<4x16xf32>
    %67 = arith.addf %12, %66 : vector<4x16xf32>
    %68 = vector.extract_strided_slice %64 {offsets = [1, 0], sizes = [4, 32], strides = [1, 1]} : vector<5x32xbf16> to vector<4x32xbf16>
    %cst_40 = arith.constant dense<0.000000e+00> : vector<4x16xf32>
    %69 = tpu.matmul %68, %5, %cst_40 {dimension_numbers = #tpu.dot_dimension_numbers<[1], [0], [0], [1], [0, 0, 1, 1], [], []>} : vector<4x32xbf16>, vector<32x16xbf16>, vector<4x16xf32> -> vector<4x16xf32>
    %70 = arith.addf %67, %69 : vector<4x16xf32>
    %71 = vector.extract_strided_slice %1 {offsets = [3, 0, 0], sizes = [1, 5, 32], strides = [1, 1, 1]} : vector<5x5x32xbf16> to vector<1x5x32xbf16>
    %72 = vector.shape_cast %71 : vector<1x5x32xbf16> to vector<5x32xbf16>
    %73 = vector.extract_strided_slice %72 {offsets = [0, 0], sizes = [4, 32], strides = [1, 1]} : vector<5x32xbf16> to vector<4x32xbf16>
    %cst_41 = arith.constant dense<0.000000e+00> : vector<4x16xf32>
    %74 = tpu.matmul %73, %7, %cst_41 {dimension_numbers = #tpu.dot_dimension_numbers<[1], [0], [0], [1], [0, 0, 1, 1], [], []>} : vector<4x32xbf16>, vector<32x16xbf16>, vector<4x16xf32> -> vector<4x16xf32>
    %75 = arith.addf %70, %74 : vector<4x16xf32>
    %76 = vector.extract_strided_slice %72 {offsets = [1, 0], sizes = [4, 32], strides = [1, 1]} : vector<5x32xbf16> to vector<4x32xbf16>
    %cst_42 = arith.constant dense<0.000000e+00> : vector<4x16xf32>
    %77 = tpu.matmul %76, %9, %cst_42 {dimension_numbers = #tpu.dot_dimension_numbers<[1], [0], [0], [1], [0, 0, 1, 1], [], []>} : vector<4x32xbf16>, vector<32x16xbf16>, vector<4x16xf32> -> vector<4x16xf32>
    %78 = arith.addf %75, %77 : vector<4x16xf32>
    %cst_43 = arith.constant 0.000000e+00 : f32
    %79 = vector.broadcast %cst_43 : f32 to vector<4x16xf32>
    %80 = arith.cmpf oge, %78, %79 : vector<4x16xf32>
    %cst_44 = arith.constant 0.00999999977 : f32
    %81 = vector.broadcast %cst_44 : f32 to vector<4x16xf32>
    %82 = arith.mulf %81, %78 : vector<4x16xf32>
    %83 = arith.select %80, %78, %82 : vector<4x16xi1>, vector<4x16xf32>
    %84 = arith.truncf %83 : vector<4x16xf32> to vector<4x16xbf16>
    %c0_45 = arith.constant 0 : index
    %c2 = arith.constant 2 : index
    %c0_46 = arith.constant 0 : index
    %c0_47 = arith.constant 0 : index
    %85 = vector.load %arg4[%c0_45, %c2, %c0_46, %c0_47] : memref<1x4x4x16xbf16, #tpu.memory_space<vmem>>, vector<1x1x4x16xbf16>
    %86 = vector.shape_cast %85 : vector<1x1x4x16xbf16> to vector<4x16xbf16>
    %87 = vector.shape_cast %84 : vector<4x16xbf16> to vector<1x1x4x16xbf16>
    tpu.vector_store %arg4[%c0_45, %c2, %c0_46, %c0_47], %87 {strides = array<i32>} : memref<1x4x4x16xbf16, #tpu.memory_space<vmem>>, vector<1x1x4x16xbf16>,
    %88 = vector.extract_strided_slice %1 {offsets = [3, 0, 0], sizes = [1, 5, 32], strides = [1, 1, 1]} : vector<5x5x32xbf16> to vector<1x5x32xbf16>
    %89 = vector.shape_cast %88 : vector<1x5x32xbf16> to vector<5x32xbf16>
    %90 = vector.extract_strided_slice %89 {offsets = [0, 0], sizes = [4, 32], strides = [1, 1]} : vector<5x32xbf16> to vector<4x32xbf16>
    %cst_48 = arith.constant dense<0.000000e+00> : vector<4x16xf32>
    %91 = tpu.matmul %90, %3, %cst_48 {dimension_numbers = #tpu.dot_dimension_numbers<[1], [0], [0], [1], [0, 0, 1, 1], [], []>} : vector<4x32xbf16>, vector<32x16xbf16>, vector<4x16xf32> -> vector<4x16xf32>
    %92 = arith.addf %12, %91 : vector<4x16xf32>
    %93 = vector.extract_strided_slice %89 {offsets = [1, 0], sizes = [4, 32], strides = [1, 1]} : vector<5x32xbf16> to vector<4x32xbf16>
    %cst_49 = arith.constant dense<0.000000e+00> : vector<4x16xf32>
    %94 = tpu.matmul %93, %5, %cst_49 {dimension_numbers = #tpu.dot_dimension_numbers<[1], [0], [0], [1], [0, 0, 1, 1], [], []>} : vector<4x32xbf16>, vector<32x16xbf16>, vector<4x16xf32> -> vector<4x16xf32>
    %95 = arith.addf %92, %94 : vector<4x16xf32>
    %96 = vector.extract_strided_slice %1 {offsets = [4, 0, 0], sizes = [1, 5, 32], strides = [1, 1, 1]} : vector<5x5x32xbf16> to vector<1x5x32xbf16>
    %97 = vector.shape_cast %96 : vector<1x5x32xbf16> to vector<5x32xbf16>
    %98 = vector.extract_strided_slice %97 {offsets = [0, 0], sizes = [4, 32], strides = [1, 1]} : vector<5x32xbf16> to vector<4x32xbf16>
    %cst_50 = arith.constant dense<0.000000e+00> : vector<4x16xf32>
    %99 = tpu.matmul %98, %7, %cst_50 {dimension_numbers = #tpu.dot_dimension_numbers<[1], [0], [0], [1], [0, 0, 1, 1], [], []>} : vector<4x32xbf16>, vector<32x16xbf16>, vector<4x16xf32> -> vector<4x16xf32>
    %100 = arith.addf %95, %99 : vector<4x16xf32>
    %101 = vector.extract_strided_slice %97 {offsets = [1, 0], sizes = [4, 32], strides = [1, 1]} : vector<5x32xbf16> to vector<4x32xbf16>
    %cst_51 = arith.constant dense<0.000000e+00> : vector<4x16xf32>
    %102 = tpu.matmul %101, %9, %cst_51 {dimension_numbers = #tpu.dot_dimension_numbers<[1], [0], [0], [1], [0, 0, 1, 1], [], []>} : vector<4x32xbf16>, vector<32x16xbf16>, vector<4x16xf32> -> vector<4x16xf32>
    %103 = arith.addf %100, %102 : vector<4x16xf32>
    %cst_52 = arith.constant 0.000000e+00 : f32
    %104 = vector.broadcast %cst_52 : f32 to vector<4x16xf32>
    %105 = arith.cmpf oge, %103, %104 : vector<4x16xf32>
    %cst_53 = arith.constant 0.00999999977 : f32
    %106 = vector.broadcast %cst_53 : f32 to vector<4x16xf32>
    %107 = arith.mulf %106, %103 : vector<4x16xf32>
    %108 = arith.select %105, %103, %107 : vector<4x16xi1>, vector<4x16xf32>
    %109 = arith.truncf %108 : vector<4x16xf32> to vector<4x16xbf16>
    %c0_54 = arith.constant 0 : index
    %c3 = arith.constant 3 : index
    %c0_55 = arith.constant 0 : index
    %c0_56 = arith.constant 0 : index
    %110 = vector.load %arg4[%c0_54, %c3, %c0_55, %c0_56] : memref<1x4x4x16xbf16, #tpu.memory_space<vmem>>, vector<1x1x4x16xbf16>
    %111 = vector.shape_cast %110 : vector<1x1x4x16xbf16> to vector<4x16xbf16>
    %112 = vector.shape_cast %109 : vector<4x16xbf16> to vector<1x1x4x16xbf16>
    tpu.vector_store %arg4[%c0_54, %c3, %c0_55, %c0_56], %112 {strides = array<i32>} : memref<1x4x4x16xbf16, #tpu.memory_space<vmem>>, vector<1x1x4x16xbf16>,
    return
  }
  func.func @transform_0(%arg0: i32) -> (i32, i32, i32, i32) {
    %c0_i32 = arith.constant 0 : i32
    %c0_i32_0 = arith.constant 0 : i32
    %c0_i32_1 = arith.constant 0 : i32
    %c0_i32_2 = arith.constant 0 : i32
    return %arg0, %c0_i32, %c0_i32_0, %c0_i32_1 : i32, i32, i32, i32
  }
  func.func @transform_1(%arg0: i32) -> (i32, i32, i32, i32) {
    %c0_i32 = arith.constant 0 : i32
    %c0_i32_0 = arith.constant 0 : i32
    %c0_i32_1 = arith.constant 0 : i32
    %c0_i32_2 = arith.constant 0 : i32
    %c0_i32_3 = arith.constant 0 : i32
    return %c0_i32, %c0_i32_0, %c0_i32_1, %c0_i32_2 : i32, i32, i32, i32
  }
  func.func @transform_2(%arg0: i32) -> (i32, i32) {
    %c0_i32 = arith.constant 0 : i32
    %c0_i32_0 = arith.constant 0 : i32
    %c0_i32_1 = arith.constant 0 : i32
    return %c0_i32, %c0_i32_0 : i32, i32
  }
  func.func @transform_3(%arg0: i32) -> (i32, i32, i32, i32) {
    %c0_i32 = arith.constant 0 : i32
    %c0_i32_0 = arith.constant 0 : i32
    %c0_i32_1 = arith.constant 0 : i32
    %c0_i32_2 = arith.constant 0 : i32
    return %arg0, %c0_i32, %c0_i32_0, %c0_i32_1 : i32, i32, i32, i32
  }
}

module attributes {stable_mosaic.version = 11 : i64} {
  func.func @_heads_kernel(%arg0: i32, %arg1: memref<2x256xbf16, #tpu.memory_space<vmem>>, %arg2: memref<256x20xbf16, #tpu.memory_space<vmem>>, %arg3: memref<2x20xf32, #tpu.memory_space<vmem>>) attributes {dimension_semantics = [#tpu.dimension_semantics<arbitrary>], iteration_bounds = array<i64: 1>, scalar_prefetch = 0 : i64, scratch_operands = 0 : i64, tpu.core_type = #tpu.core_type<tc>, window_params = [{pipeline_mode = #tpu.pipeline_mode<synchronous>, transform_indices = @transform_0, window_bounds = array<i64: 2, 256>}, {pipeline_mode = #tpu.pipeline_mode<synchronous>, transform_indices = @transform_1, window_bounds = array<i64: 256, 20>}, {pipeline_mode = #tpu.pipeline_mode<synchronous>, transform_indices = @transform_2, window_bounds = array<i64: 2, 20>}]} {
    %c0 = arith.constant 0 : index
    %c0_0 = arith.constant 0 : index
    %0 = vector.load %arg1[%c0, %c0_0] : memref<2x256xbf16, #tpu.memory_space<vmem>>, vector<2x256xbf16>
    %c0_1 = arith.constant 0 : index
    %c0_2 = arith.constant 0 : index
    %1 = vector.load %arg2[%c0_1, %c0_2] : memref<256x20xbf16, #tpu.memory_space<vmem>>, vector<256x20xbf16>
    %cst = arith.constant dense<0.000000e+00> : vector<2x20xf32>
    %2 = tpu.matmul %0, %1, %cst {dimension_numbers = #tpu.dot_dimension_numbers<[1], [0], [0], [1], [0, 0, 1, 1], [], []>} : vector<2x256xbf16>, vector<256x20xbf16>, vector<2x20xf32> -> vector<2x20xf32>
    %c0_3 = arith.constant 0 : index
    %c0_4 = arith.constant 0 : index
    %3 = vector.load %arg3[%c0_3, %c0_4] : memref<2x20xf32, #tpu.memory_space<vmem>>, vector<2x20xf32>
    tpu.vector_store %arg3[%c0_3, %c0_4], %2 {strides = array<i32>} : memref<2x20xf32, #tpu.memory_space<vmem>>, vector<2x20xf32>,
    return
  }
  func.func @transform_0(%arg0: i32) -> (i32, i32) {
    %c0_i32 = arith.constant 0 : i32
    %c0_i32_0 = arith.constant 0 : i32
    %c0_i32_1 = arith.constant 0 : i32
    return %c0_i32, %c0_i32_0 : i32, i32
  }
  func.func @transform_1(%arg0: i32) -> (i32, i32) {
    %c0_i32 = arith.constant 0 : i32
    %c0_i32_0 = arith.constant 0 : i32
    %c0_i32_1 = arith.constant 0 : i32
    return %c0_i32, %c0_i32_0 : i32, i32
  }
  func.func @transform_2(%arg0: i32) -> (i32, i32) {
    %c0_i32 = arith.constant 0 : i32
    %c0_i32_0 = arith.constant 0 : i32
    %c0_i32_1 = arith.constant 0 : i32
    return %c0_i32, %c0_i32_0 : i32, i32
  }
}

</mosaic_0001>

<bundles_post_ra>
// kernel: discriminator_forward.4
= control target key start
LH: loop header
LB: loop body
LE: loop exit
PB: predicated region body
PF: predicated region fallthrough
CT: control target
= control target key end

     0   :  { %s1405_s12 = smov 0   ;;  %s1592_s0 = inlined_call_operand.vmem [shape: bf16[2,5,5,32], index: 0, kind: input, shape index: {}]   ;;  %s1593_s1 = inlined_call_operand.vmem [shape: bf16[2,2,32,16], index: 1, kind: input, shape index: {}]   ;;  %s1594_s2 = inlined_call_operand.vmem [shape: f32[1,16], index: 2, kind: input, shape index: {}]   ;;  %s1595_s3 = inlined_call_operand.vmem [shape: bf16[2,4,4,16], index: 3, kind: output, shape index: {}]  }
   0x1 LB: > { %s1067_s13 = sadd.s32 4294967295, %s1381_s12   ;;  %p1071_p0 = scmp.ge.s32.totalorder %s1381_s12, 1  ;;  %s1381_s12 = sphi %s1405_s12, %s13_s12  }
   0x2   : > { %p137_p1 = scmp.lt.s32.totalorder %s1381_s12, 3 }
   0x4   : > { %p138_p2 = pnand %p1071_p0, %p137_p1 }
   0x5   : > { %v1416_v0 = vld [vmem:[%s1593_s1] sm:$0xff] (!%p138_p2)   ;;  %v1383_v1 = vmov (!%p138_p2), 0.0   ;;  %v1425_v2 = vld [vmem:[%s1593_s1 + $0x8] sm:$0xff] (!%p138_p2)   ;;  %p161_p3 = scmp.lt.s32.totalorder (!%p138_p2), %s1067_s13, 1  ;;  %vm1384_vm0 = vmmov (!%p138_p2), 0   ;;  %vm215_vm1 = vcmask (!%p138_p2), 261120  }
   0x6   : > { %141 = sbr.rel (%p138_p2) target bundleno = 318 (0x13e), region = 32  ;;  %1171 = vmatprep.subr.bf16.mxu0 (!%p138_p2), %v1383_v1  ;;  %1203 = vmatprep.subr.bf16.mxu1 (!%p138_p2), %v1383_v1  ;;  %v1443_v3 = vld [vmem:[%s1593_s1 + $0x10] sm:$0xff] (!%p138_p2)   ;;  %v1459_v8 = vld [vmem:[%s1593_s1 + $0x18] sm:$0xff] (!%p138_p2)   ;;  %v1474_v17 = vld [vmem:[%s1593_s1 + $0x20] sm:$0xff] (!%p138_p2)   ;;  %vm452_vm4 = vcmask (!%p138_p2), 123904  }
   0x7   : > { %1172 = vmatpush3.bf16.msra.mxu0 (!%p138_p2), %v1416_v0  ;;  %1204 = vmatpush3.bf16.msra.mxu1 (!%p138_p2), %v1416_v0  ;;  %v1483_v18 = vld [vmem:[%s1593_s1 + $0x28] sm:$0xff] (!%p138_p2)   ;;  %v1499_v21 = vld [vmem:[%s1593_s1 + $0x30] sm:$0xff] (!%p138_p2)   ;;  %v1508_v23 = vld [vmem:[%s1593_s1 + $0x38] sm:$0xff] (!%p138_p2)  }
   0x8   : > { %1173 = vmatprep.subr.bf16.mxu0 (!%p138_p2), %v1383_v1  ;;  %1205 = vmatprep.subr.bf16.mxu1 (!%p138_p2), %v1383_v1  ;;  %v1087_v39 = vld [vmem:[%s1594_s2] ss:$0 sm:$0xff] (!%p138_p2) }
   0x9   : > { %1175 = vmatprep.mubr.msk.bf16.mxu0 (!%p138_p2), %vm1384_vm0, %v1383_v1  ;;  %1207 = vmatprep.mubr.msk.bf16.mxu1 (!%p138_p2), %vm1384_vm0, %v1383_v1 }
   0xb   : > { %1174 = vmatpush3.bf16.msra.mxu0 (!%p138_p2), %v1425_v2  ;;  %1206 = vmatpush3.bf16.msra.mxu1 (!%p138_p2), %v1425_v2 }
   0xc   : > { %1179 = vmatprep.subr.bf16.mxu0 (!%p138_p2), %v1383_v1  ;;  %1211 = vmatprep.subr.bf16.mxu1 (!%p138_p2), %v1383_v1 }
   0xd   : > { %s1597_s13 = smov (!%p161_p3, %s1067_s13), 1 }
   0xe   : > { %s1351_s18 = smul.u32 20, %s1597_s13  ;;  %s1122_s9 = sshll.u32 %s1597_s13, 3 }
   0xf   : > { %s170_s14 = scalar_lea.vmem %s1595_s3, %s1122_s9 }
  0x10   : > { %s1448_s23 = scalar_lea.vmem %s1592_s0, %s1351_s18 }
  0x11   : > { %v172_v4 = vld [vmem:[%s1448_s23] sm:$0x7]  ;;  %v173_v5 = vld [vmem:[%s1448_s23 + $0x4] sm:$0x7]  ;;  %v174_v19 = vld [vmem:[%s1448_s23 + $0x8] sm:$0x7] }
  0x12   : > { %1176 = vmatmul.mubr.msk.bf16.vlgmr.msra.gmra.mrb[0].mxu0 %vm215_vm1, %v172_v4  ;;  %v1091_v6 = vcombine.low %v172_v4, %v172_v4  ;;  %v1098_v7 = vcombine.low %v173_v5, %v173_v5  ;;  %1208 = vmatmul.mubr.msk.bf16.vlgmr.msra.gmra.mrb[0].mxu1 %vm215_vm1, %v173_v5  ;;  %v1105_v20 = vcombine.low %v174_v19, %v174_v19  ;;  %v175_v27 = vld [vmem:[%s1448_s23 + $0xc] sm:$0x7]  ;;  %v176_v33 = vld [vmem:[%s1448_s23 + $0x10] sm:$0x7] }
  0x13   : > { %1180 = vmatpush3.bf16.msra.mxu0 %v1443_v3  ;;  %1212 = vmatpush3.bf16.msra.mxu1 %v1443_v3  ;;  %v1111_v28 = vcombine.low %v175_v27, %v175_v27  ;;  %v1117_v34 = vcombine.low %v176_v33, %v176_v33 }
  0x14   : > { %v266_v9 = vshll.u32 %v1091_v6, 16  ;;  %v388_v10 = vshll.u32 %v1098_v7, 16  ;;  %1181 = vmatprep.subr.bf16.mxu0 %v1383_v1  ;;  %1213 = vmatprep.subr.bf16.mxu1 %v1383_v1  ;;  %v264_v11 = vshrl.u32 %v1091_v6, 16  ;;  %v386_v13 = vshrl.u32 %v1098_v7, 16 }
  0x15   : > { %1183 = vmatprep.mubr.msk.bf16.mxu0 %vm1384_vm0, %v1383_v1  ;;  %1215 = vmatprep.mubr.msk.bf16.mxu1 %vm1384_vm0, %v1383_v1  ;;  %v586_v22 = vshll.u32 %v1105_v20, 16  ;;  %v584_v24 = vshrl.u32 %v1105_v20, 16  ;;  %v772_v29 = vshll.u32 %v1111_v28, 16  ;;  %v770_v30 = vshrl.u32 %v1111_v28, 16 }
  0x16   : > { %v268_v12 = vrot.slane %v266_v9, 1  ;;  %v390_v14 = vrot.slane %v388_v10, 1  ;;  %v958_v35 = vshll.u32 %v1117_v34, 16  ;;  %v956_v36 = vshrl.u32 %v1117_v34, 16 }
  0x17   : > { %1182 = vmatpush3.bf16.msra.mxu0 %v1459_v8  ;;  %1214 = vmatpush3.bf16.msra.mxu1 %v1459_v8  ;;  %v588_v25 = vrot.slane %v586_v22, 1  ;;  %v774_v31 = vrot.slane %v772_v29, 1 }
  0x18   : > { %1187 = vmatprep.subr.bf16.mxu0 %v1383_v1  ;;  %1219 = vmatprep.subr.bf16.mxu1 %v1383_v1  ;;  %v269_v15 = vor.u32 %v268_v12, %v264_v11  ;;  %v391_v16 = vor.u32 %v390_v14, %v386_v13  ;;  %v960_v37 = vrot.slane %v958_v35, 1 }
  0x19   : > { %v589_v26 = vor.u32 %v588_v25, %v584_v24  ;;  %v775_v32 = vor.u32 %v774_v31, %v770_v30 }
  0x1a   : > { %v961_v38 = vor.u32 %v960_v37, %v956_v36 }
  0x1e   : > { %1184 = vmatmul.mubr.msk.bf16.vlgmr.msra.gmra.mrb[0].mxu0 %vm215_vm1, %v269_v15  ;;  %1216 = vmatmul.mubr.msk.bf16.vlgmr.msra.gmra.mrb[0].mxu1 %vm215_vm1, %v391_v16 }
  0x1f   : > { %1188 = vmatpush3.bf16.msra.mxu0 %v1474_v17  ;;  %1220 = vmatpush3.bf16.msra.mxu1 %v1474_v17 }
  0x20   : > { %1189 = vmatprep.subr.bf16.mxu0 %v1383_v1  ;;  %1221 = vmatprep.subr.bf16.mxu1 %v1383_v1 }
  0x21   : > { %1191 = vmatprep.mubr.msk.bf16.mxu0 %vm1384_vm0, %v1383_v1  ;;  %1223 = vmatprep.mubr.msk.bf16.mxu1 %vm1384_vm0, %v1383_v1 }
  0x23   : > { %1190 = vmatpush3.bf16.msra.mxu0 %v1483_v18  ;;  %1222 = vmatpush3.bf16.msra.mxu1 %v1483_v18 }
  0x24   : > { %1195 = vmatprep.subr.bf16.mxu0 %v1383_v1  ;;  %1227 = vmatprep.subr.bf16.mxu1 %v1383_v1 }
  0x2a   : > { %1192 = vmatmul.mubr.msk.bf16.vlgmr.msra.gmra.mrb[0].mxu0 %vm215_vm1, %v173_v5  ;;  %1224 = vmatmul.mubr.msk.bf16.vlgmr.msra.gmra.mrb[0].mxu1 %vm215_vm1, %v174_v19 }
  0x2b   : > { %1196 = vmatpush3.bf16.msra.mxu0 %v1499_v21  ;;  %1228 = vmatpush3.bf16.msra.mxu1 %v1499_v21 }
  0x2c   : > { %1197 = vmatprep.subr.bf16.mxu0 %v1383_v1  ;;  %1229 = vmatprep.subr.bf16.mxu1 %v1383_v1 }
  0x2d   : > { %1199 = vmatprep.mubr.msk.bf16.mxu0 %vm1384_vm0, %v1383_v1  ;;  %1231 = vmatprep.mubr.msk.bf16.mxu1 %vm1384_vm0, %v1383_v1 }
  0x2f   : > { %1198 = vmatpush3.bf16.msra.mxu0 %v1508_v23  ;;  %1230 = vmatpush3.bf16.msra.mxu1 %v1508_v23 }
  0x30   : > { %1235 = vmatprep.subr.bf16.mxu0 %v1383_v1  ;;  %1267 = vmatprep.subr.bf16.mxu1 %v1383_v1 }
  0x36   : > { %1200 = vmatmul.mubr.msk.bf16.vlgmr.msra.gmra.mrb[0].mxu0 %vm215_vm1, %v391_v16  ;;  %1232 = vmatmul.mubr.msk.bf16.vlgmr.msra.gmra.mrb[0].mxu1 %vm215_vm1, %v589_v26 }
  0x37   : > { %1236 = vmatpush3.bf16.msra.mxu0 %v1416_v0  ;;  %1268 = vmatpush3.bf16.msra.mxu1 %v1416_v0 }
  0x38   : > { %1237 = vmatprep.subr.bf16.mxu0 %v1383_v1  ;;  %1269 = vmatprep.subr.bf16.mxu1 %v1383_v1 }
  0x39   : > { %1239 = vmatprep.mubr.msk.bf16.mxu0 %vm1384_vm0, %v1383_v1  ;;  %1271 = vmatprep.mubr.msk.bf16.mxu1 %vm1384_vm0, %v1383_v1 }
  0x3b   : > { %1238 = vmatpush3.bf16.msra.mxu0 %v1425_v2  ;;  %1270 = vmatpush3.bf16.msra.mxu1 %v1425_v2 }
  0x3c   : > { %1243 = vmatprep.subr.bf16.mxu0 %v1383_v1  ;;  %1275 = vmatprep.subr.bf16.mxu1 %v1383_v1 }
  0x3e   : > { %1240 = vmatmul.mubr.msk.bf16.vlgmr.msra.gmra.mrb[4].mxu0 %vm215_vm1, %v174_v19  ;;  %1272 = vmatmul.mubr.msk.bf16.vlgmr.msra.gmra.mrb[4].mxu1 %vm215_vm1, %v175_v27 }
  0x3f   : > { %1244 = vmatpush3.bf16.msra.mxu0 %v1443_v3  ;;  %1276 = vmatpush3.bf16.msra.mxu1 %v1443_v3 }
  0x40   : > { %1245 = vmatprep.subr.bf16.mxu0 %v1383_v1  ;;  %1277 = vmatprep.subr.bf16.mxu1 %v1383_v1 }
  0x41   : > { %1247 = vmatprep.mubr.msk.bf16.mxu0 %vm1384_vm0, %v1383_v1  ;;  %1279 = vmatprep.mubr.msk.bf16.mxu1 %vm1384_vm0, %v1383_v1 }
  0x43   : > { %1246 = vmatpush3.bf16.msra.mxu0 %v1459_v8  ;;  %1278 = vmatpush3.bf16.msra.mxu1 %v1459_v8 }
  0x44   : > { %1251 = vmatprep.subr.bf16.mxu0 %v1383_v1  ;;  %1283 = vmatprep.subr.bf16.mxu1 %v1383_v1 }
  0x4a   : > { %1248 = vmatmul.mubr.msk.bf16.vlgmr.msra.gmra.mrb[4].mxu0 %vm215_vm1, %v589_v26  ;;  %1280 = vmatmul.mubr.msk.bf16.vlgmr.msra.gmra.mrb[4].mxu1 %vm215_vm1, %v775_v32 }
  0x4b   : > { %1252 = vmatpush3.bf16.msra.mxu0 %v1474_v17  ;;  %1284 = vmatpush3.bf16.msra.mxu1 %v1474_v17 }
  0x4c   : > { %1253 = vmatprep.subr.bf16.mxu0 %v1383_v1  ;;  %1285 = vmatprep.subr.bf16.mxu1 %v1383_v1 }
  0x4d   : > { %1255 = vmatprep.mubr.msk.bf16.mxu0 %vm1384_vm0, %v1383_v1  ;;  %1287 = vmatprep.mubr.msk.bf16.mxu1 %vm1384_vm0, %v1383_v1 }
  0x4f   : > { %1254 = vmatpush3.bf16.msra.mxu0 %v1483_v18  ;;  %1286 = vmatpush3.bf16.msra.mxu1 %v1483_v18 }
  0x50   : > { %1259 = vmatprep.subr.bf16.mxu0 %v1383_v1  ;;  %1291 = vmatprep.subr.bf16.mxu1 %v1383_v1 }
  0x56   : > { %1256 = vmatmul.mubr.msk.bf16.vlgmr.msra.gmra.mrb[4].mxu0 %vm215_vm1, %v175_v27  ;;  %1288 = vmatmul.mubr.msk.bf16.vlgmr.msra.gmra.mrb[4].mxu1 %vm215_vm1, %v176_v33 }
  0x57   : > { %1260 = vmatpush3.bf16.msra.mxu0 %v1499_v21  ;;  %1292 = vmatpush3.bf16.msra.mxu1 %v1499_v21 }
  0x58   : > { %1261 = vmatprep.subr.bf16.mxu0 %v1383_v1  ;;  %1293 = vmatprep.subr.bf16.mxu1 %v1383_v1 }
  0x59   : > { %1263 = vmatprep.mubr.msk.bf16.mxu0 %vm1384_vm0, %v1383_v1  ;;  %1295 = vmatprep.mubr.msk.bf16.mxu1 %vm1384_vm0, %v1383_v1 }
  0x5b   : > { %1262 = vmatpush3.bf16.msra.mxu0 %v1508_v23  ;;  %1294 = vmatpush3.bf16.msra.mxu1 %v1508_v23 }
  0x62   : > { %1264 = vmatmul.mubr.msk.bf16.vlgmr.msra.gmra.mrb[4].mxu0 %vm215_vm1, %v775_v32  ;;  %1296 = vmatmul.mubr.msk.bf16.vlgmr.msra.gmra.mrb[4].mxu1 %vm215_vm1, %v961_v38 }
 0x109   : > { %v441_v40 = vpop.f32.mrb[0].mxu0  ;;  %v627_v41 = vpop.f32.mrb[0].mxu1 }
 0x10a   : > { %v1299_v42 = vadd.f32 %v1087_v39, %v441_v40  ;;  %v1300_v43 = vadd.f32 %v1087_v39, %v627_v41  ;;  %v1201_v44 = vpop.f32.mrb[1].mxu0  ;;  %v1233_v45 = vpop.f32.mrb[1].mxu1 }
 0x10b   : > { %v444_v46 = vpop.f32.mrb[2].mxu0  ;;  %v630_v47 = vpop.f32.mrb[2].mxu1 }
 0x10c   : > { %vm448_vm2 = vcmp.ge.f32.partialorder %v1299_v42, 0.0  ;;  %v449_v48 = vmul.f32 0.01, %v1299_v42  ;;  %vm634_vm3 = vcmp.ge.f32.partialorder %v1300_v43, 0.0  ;;  %v635_v49 = vmul.f32 0.01, %v1300_v43 }
 0x10d   : > { %v1202_v50 = vpop.f32.mrb[3].mxu0  ;;  %v1234_v51 = vpop.f32.mrb[3].mxu1 }
 0x10e   : > { %v450_v52 = vsel %vm448_vm2, %v1299_v42, %v449_v48  ;;  %v636_v53 = vsel %vm634_vm3, %v1300_v43, %v635_v49 }
 0x10f   : > { %v451_v54 = vpack.c.bf16 %v450_v52, %v450_v52  ;;  %v637_v55 = vpack.c.bf16 %v636_v53, %v636_v53 }
 0x111   : > { %453 = vst.msk [vmem:[%s170_s14] sm:$0x3] %vm452_vm4, %v451_v54  ;;  %1107 = vst.msk [vmem:[%s170_s14 + $0x2] sm:$0x3] %vm452_vm4, %v637_v55 }
 0x135   : > { %v813_v56 = vpop.f32.mrb[4].mxu0  ;;  %v999_v57 = vpop.f32.mrb[4].mxu1 }
 0x136   : > { %v1301_v58 = vadd.f32 %v1087_v39, %v813_v56  ;;  %v1302_v59 = vadd.f32 %v1087_v39, %v999_v57  ;;  %v1265_v60 = vpop.f32.mrb[5].mxu0  ;;  %v1297_v61 = vpop.f32.mrb[5].mxu1 }
 0x137   : > { %v816_v62 = vpop.f32.mrb[6].mxu0  ;;  %v1002_v63 = vpop.f32.mrb[6].mxu1 }
 0x138   : > { %vm820_vm5 = vcmp.ge.f32.partialorder %v1301_v58, 0.0  ;;  %v821_v0 = vmul.f32 0.01, %v1301_v58  ;;  %vm1006_vm6 = vcmp.ge.f32.partialorder %v1302_v59, 0.0  ;;  %v1007_v1 = vmul.f32 0.01, %v1302_v59 }
 0x139   : > { %v1266_v2 = vpop.f32.mrb[7].mxu0  ;;  %v1298_v3 = vpop.f32.mrb[7].mxu1 }
 0x13a   : > { %v822_v4 = vsel %vm820_vm5, %v1301_v58, %v821_v0  ;;  %v1008_v5 = vsel %vm1006_vm6, %v1302_v59, %v1007_v1 }
 0x13b   : > { %v823_v6 = vpack.c.bf16 %v822_v4, %v822_v4  ;;  %v1009_v7 = vpack.c.bf16 %v1008_v5, %v1008_v5 }
 0x13d   : > { %1113 = vst.msk [vmem:[%s170_s14 + $0x4] sm:$0x3] %vm452_vm4, %v823_v6  ;;  %1119 = vst.msk [vmem:[%s170_s14 + $0x6] sm:$0x3] %vm452_vm4, %v1009_v7 }
 0x13e PF: > { %s13_s12 = sadd.s32 1, %s1381_s12  }
 0x13f   : > { %p10_p4 = scmp.ge.s32.totalorder %s13_s12, 4  }
 0x141   :  { %12 = sbr.rel (!%p10_p4) target bundleno = 1 (0x1), region = 68 }

// kernel: discriminator_forward.3
= control target key start
LH: loop header
LB: loop body
LE: loop exit
PB: predicated region body
PF: predicated region fallthrough
CT: control target
= control target key end

     0   :  { %s2240_s12 = smov 0   ;;  %s2496_s0 = inlined_call_operand.vmem [shape: f32[2,9,9,12], index: 0, kind: input, shape index: {}]   ;;  %s2497_s1 = inlined_call_operand.vmem [shape: bf16[2,2,12,8], index: 1, kind: input, shape index: {}]   ;;  %s2498_s2 = inlined_call_operand.vmem [shape: f32[1,8], index: 2, kind: input, shape index: {}]   ;;  %s2499_s3 = inlined_call_operand.vmem [shape: bf16[2,8,8,8], index: 3, kind: output, shape index: {}]  }
   0x1 LB: > { %s1774_s13 = sadd.s32 4294967295, %s2216_s12   ;;  %p1778_p0 = scmp.ge.s32.totalorder %s2216_s12, 1  ;;  %s2216_s12 = sphi %s2240_s12, %s13_s12  }
   0x2   : > { %p137_p1 = scmp.lt.s32.totalorder %s2216_s12, 3 }
   0x4   : > { %p138_p2 = pnand %p1778_p0, %p137_p1 }
   0x5   : > { %vm226_vm0 = vcmask (!%p138_p2), 1045504   ;;  %v2218_v0 = vmov (!%p138_p2), 0.0   ;;  %v2206_v1 = vld [vmem:[%s2497_s1] sm:$0x3f] (!%p138_p2)   ;;  %p161_p3 = scmp.lt.s32.totalorder (!%p138_p2), %s1774_s13, 1  ;;  %vm2219_vm1 = vmmov (!%p138_p2), 0  }
   0x6   : > { %141 = sbr.rel (%p138_p2) target bundleno = 409 (0x199), region = 32  ;;  %1899 = vmatprep.subr.bf16.mxu0 (!%p138_p2), %v2218_v0  ;;  %1923 = vmatprep.subr.bf16.mxu1 (!%p138_p2), %v2218_v0  ;;  %v2258_v2 = vsel (!%p138_p2), %vm226_vm0, %v2206_v1, 0  ;;  %v2207_v3 = vld [vmem:[%s2497_s1 + $0x8] sm:$0x3f] (!%p138_p2)   ;;  %vm222_vm2 = vcmask (!%p138_p2), 97280   ;;  %vm443_vm5 = vcmask (!%p138_p2), 60416  }
   0x7   : > { %1901 = vmatprep.mubr.msk.bf16.mxu0 (!%p138_p2), %vm2219_vm1, %v2218_v0  ;;  %1925 = vmatprep.mubr.msk.bf16.mxu1 (!%p138_p2), %vm2219_vm1, %v2218_v0  ;;  %v2279_v8 = vsel (!%p138_p2), %vm226_vm0, %v2207_v3, 0  ;;  %v2208_v17 = vld [vmem:[%s2497_s1 + $0x10] sm:$0x3f] (!%p138_p2)   ;;  %v2209_v21 = vld [vmem:[%s2497_s1 + $0x18] sm:$0x3f] (!%p138_p2)  }
   0x8   : > { %1900 = vmatpush3.bf16.msra.mxu0 (!%p138_p2), %v2258_v2  ;;  %1924 = vmatpush3.bf16.msra.mxu1 (!%p138_p2), %v2258_v2  ;;  %v2296_v20 = vsel (!%p138_p2), %vm226_vm0, %v2208_v17, 0  ;;  %v2314_v25 = vsel (!%p138_p2), %vm226_vm0, %v2209_v21, 0 }
   0x9   : > { %1905 = vmatprep.subr.bf16.mxu0 (!%p138_p2), %v2218_v0  ;;  %1929 = vmatprep.subr.bf16.mxu1 (!%p138_p2), %v2218_v0 }
   0xd   : > { %s2501_s13 = smov (!%p161_p3, %s1774_s13), 1 }
   0xe   : > { %s2195_s16 = smul.u32 144, %s2501_s13  ;;  %s1834_s28 = sshll.u32 %s2501_s13, 5 }
   0xf   : > { %s2469_s4 = scalar_lea.vmem %s2499_s3, %s1834_s28 }
  0x10   : > { %s2273_s21 = scalar_lea.vmem %s2496_s0, %s2195_s16 }
  0x11   : > { %v172_v4 = vld [vmem:[%s2273_s21] sm:$0xff]  ;;  %v173_v5 = vld [vmem:[%s2273_s21 + $0x8] sm:$0x1]  ;;  %v174_v6 = vld [vmem:[%s2273_s21 + $0x10] sm:$0xff] }
  0x12   : > { %v190_v7 = vpack.c.bf16 %v173_v5, %v172_v4  ;;  %v175_v9 = vld [vmem:[%s2273_s21 + $0x18] sm:$0x1]  ;;  %v176_v22 = vld [vmem:[%s2273_s21 + $0x20] sm:$0xff]  ;;  %v177_v23 = vld [vmem:[%s2273_s21 + $0x28] sm:$0x1] }
  0x13   : > { %v191_v10 = vpack.c.bf16 %v175_v9, %v174_v6  ;;  %v192_v24 = vpack.c.bf16 %v177_v23, %v176_v22  ;;  %v178_v30 = vld [vmem:[%s2273_s21 + $0x30] sm:$0xff]  ;;  %v179_v31 = vld [vmem:[%s2273_s21 + $0x38] sm:$0x1]  ;;  %v180_v37 = vld [vmem:[%s2273_s21 + $0x40] sm:$0xff] }
  0x14   : > { %1902 = vmatmul.mubr.msk.bf16.vlgmr.msra.gmra.mrb[0].mxu0 %vm222_vm2, %v190_v7  ;;  %v273_v11 = vshll.u32 %v190_v7, 16  ;;  %v271_v13 = vshrl.u32 %v190_v7, 16  ;;  %v193_v32 = vpack.c.bf16 %v179_v31, %v178_v30  ;;  %v181_v38 = vld [vmem:[%s2273_s21 + $0x48] sm:$0x1]  ;;  %v182_v44 = vld [vmem:[%s2273_s21 + $0x50] sm:$0xff]  ;;  %v184_v51 = vld [vmem:[%s2273_s21 + $0x60] sm:$0xff] }
  0x15   : > { %1906 = vmatpush3.bf16.msra.mxu0 %v2279_v8  ;;  %1926 = vmatmul.mubr.msk.bf16.vlgmr.msra.gmra.mrb[0].mxu1 %vm222_vm2, %v191_v10  ;;  %v383_v12 = vshll.u32 %v191_v10, 16  ;;  %v381_v15 = vshrl.u32 %v191_v10, 16  ;;  %v573_v26 = vshll.u32 %v192_v24, 16  ;;  %v571_v27 = vshrl.u32 %v192_v24, 16  ;;  %v183_v45 = vld [vmem:[%s2273_s21 + $0x58] sm:$0x1] }
  0x16   : > { %1930 = vmatpush3.bf16.msra.mxu1 %v2279_v8  ;;  %1907 = vmatprep.mubr.msk.bf16.mxu0 %vm2219_vm1, %v2218_v0  ;;  %v275_v14 = vrot.slane %v273_v11, 1  ;;  %v755_v33 = vshll.u32 %v193_v32, 16  ;;  %v753_v34 = vshrl.u32 %v193_v32, 16  ;;  %v194_v39 = vpack.c.bf16 %v181_v38, %v180_v37  ;;  %v185_v52 = vld [vmem:[%s2273_s21 + $0x68] sm:$0x1]  ;;  %v186_v58 = vld [vmem:[%s2273_s21 + $0x70] sm:$0xff] }
  0x17   : > { %1911 = vmatprep.subr.bf16.mxu0 %v2218_v0  ;;  %1931 = vmatprep.mubr.msk.bf16.mxu1 %vm2219_vm1, %v2218_v0  ;;  %v385_v16 = vrot.slane %v383_v12, 1  ;;  %v575_v28 = vrot.slane %v573_v26, 1  ;;  %v195_v46 = vpack.c.bf16 %v183_v45, %v182_v44  ;;  %v196_v53 = vpack.c.bf16 %v185_v52, %v184_v51  ;;  %v187_v59 = vld [vmem:[%s2273_s21 + $0x78] sm:$0x1]  ;;  %v189_v3 = vld [vmem:[%s2273_s21 + $0x88] sm:$0x1] }
  0x18   : > { %1935 = vmatprep.subr.bf16.mxu1 %v2218_v0  ;;  %v276_v18 = vor.u32 %v275_v14, %v271_v13  ;;  %v757_v35 = vrot.slane %v755_v33, 1  ;;  %v937_v40 = vshll.u32 %v194_v39, 16  ;;  %v935_v41 = vshrl.u32 %v194_v39, 16  ;;  %v2461_v9 = vld [vmem:[%s2498_s2] ss:$0 sm:$0xff] }
  0x19   : > { %v386_v19 = vor.u32 %v385_v16, %v381_v15  ;;  %v576_v29 = vor.u32 %v575_v28, %v571_v27  ;;  %v1119_v47 = vshll.u32 %v195_v46, 16  ;;  %v1117_v48 = vshrl.u32 %v195_v46, 16 }
  0x1a   : > { %v758_v36 = vor.u32 %v757_v35, %v753_v34  ;;  %v939_v42 = vrot.slane %v937_v40, 1  ;;  %v1301_v54 = vshll.u32 %v196_v53, 16  ;;  %v1299_v55 = vshrl.u32 %v196_v53, 16 }
  0x1b   : > { %v1121_v49 = vrot.slane %v1119_v47, 1  ;;  %v197_v60 = vpack.c.bf16 %v187_v59, %v186_v58 }
  0x1c   : > { %v940_v43 = vor.u32 %v939_v42, %v935_v41  ;;  %v1303_v56 = vrot.slane %v1301_v54, 1 }
  0x1d   : > { %v1122_v50 = vor.u32 %v1121_v49, %v1117_v48  ;;  %v1483_v61 = vshll.u32 %v197_v60, 16  ;;  %v1481_v62 = vshrl.u32 %v197_v60, 16 }
  0x1e   : > { %v1304_v57 = vor.u32 %v1303_v56, %v1299_v55 }
  0x1f   : > { %v1485_v63 = vrot.slane %v1483_v61, 1 }
  0x20   : > { %1908 = vmatmul.mubr.msk.bf16.vlgmr.msra.gmra.mrb[0].mxu0 %vm222_vm2, %v276_v18 }
  0x21   : > { %1912 = vmatpush3.bf16.msra.mxu0 %v2296_v20  ;;  %1932 = vmatmul.mubr.msk.bf16.vlgmr.msra.gmra.mrb[0].mxu1 %vm222_vm2, %v386_v19  ;;  %v1486_v1 = vor.u32 %v1485_v63, %v1481_v62 }
  0x22   : > { %1936 = vmatpush3.bf16.msra.mxu1 %v2296_v20  ;;  %1913 = vmatprep.mubr.msk.bf16.mxu0 %vm2219_vm1, %v2218_v0 }
  0x23   : > { %1917 = vmatprep.subr.bf16.mxu0 %v2218_v0  ;;  %1937 = vmatprep.mubr.msk.bf16.mxu1 %vm2219_vm1, %v2218_v0 }
  0x24   : > { %1941 = vmatprep.subr.bf16.mxu1 %v2218_v0 }
  0x2c   : > { %1914 = vmatmul.mubr.msk.bf16.vlgmr.msra.gmra.mrb[0].mxu0 %vm222_vm2, %v191_v10 }
  0x2d   : > { %1918 = vmatpush3.bf16.msra.mxu0 %v2314_v25  ;;  %1938 = vmatmul.mubr.msk.bf16.vlgmr.msra.gmra.mrb[0].mxu1 %vm222_vm2, %v192_v24 }
  0x2e   : > { %1942 = vmatpush3.bf16.msra.mxu1 %v2314_v25  ;;  %1919 = vmatprep.mubr.msk.bf16.mxu0 %vm2219_vm1, %v2218_v0 }
  0x2f   : > { %1943 = vmatprep.mubr.msk.bf16.mxu1 %vm2219_vm1, %v2218_v0  ;;  %1947 = vmatprep.subr.bf16.mxu0 %v2218_v0 }
  0x30   : > { %1971 = vmatprep.subr.bf16.mxu1 %v2218_v0 }
  0x38   : > { %1920 = vmatmul.mubr.msk.bf16.vlgmr.msra.gmra.mrb[0].mxu0 %vm222_vm2, %v386_v19 }
  0x39   : > { %1944 = vmatmul.mubr.msk.bf16.vlgmr.msra.gmra.mrb[0].mxu1 %vm222_vm2, %v576_v29  ;;  %1948 = vmatpush3.bf16.msra.mxu0 %v2258_v2 }
  0x3a   : > { %1972 = vmatpush3.bf16.msra.mxu1 %v2258_v2  ;;  %1949 = vmatprep.mubr.msk.bf16.mxu0 %vm2219_vm1, %v2218_v0 }
  0x3b   : > { %1953 = vmatprep.subr.bf16.mxu0 %v2218_v0  ;;  %1973 = vmatprep.mubr.msk.bf16.mxu1 %vm2219_vm1, %v2218_v0 }
  0x3c   : > { %1977 = vmatprep.subr.bf16.mxu1 %v2218_v0 }
  0x40   : > { %1950 = vmatmul.mubr.msk.bf16.vlgmr.msra.gmra.mrb[4].mxu0 %vm222_vm2, %v192_v24 }
  0x41   : > { %1954 = vmatpush3.bf16.msra.mxu0 %v2279_v8  ;;  %1974 = vmatmul.mubr.msk.bf16.vlgmr.msra.gmra.mrb[4].mxu1 %vm222_vm2, %v193_v32 }
  0x42   : > { %1978 = vmatpush3.bf16.msra.mxu1 %v2279_v8  ;;  %1955 = vmatprep.mubr.msk.bf16.mxu0 %vm2219_vm1, %v2218_v0 }
  0x43   : > { %1959 = vmatprep.subr.bf16.mxu0 %v2218_v0  ;;  %1979 = vmatprep.mubr.msk.bf16.mxu1 %vm2219_vm1, %v2218_v0 }
  0x44   : > { %1983 = vmatprep.subr.bf16.mxu1 %v2218_v0 }
  0x4c   : > { %1956 = vmatmul.mubr.msk.bf16.vlgmr.msra.gmra.mrb[4].mxu0 %vm222_vm2, %v576_v29 }
  0x4d   : > { %1960 = vmatpush3.bf16.msra.mxu0 %v2296_v20  ;;  %1980 = vmatmul.mubr.msk.bf16.vlgmr.msra.gmra.mrb[4].mxu1 %vm222_vm2, %v758_v36 }
  0x4e   : > { %1984 = vmatpush3.bf16.msra.mxu1 %v2296_v20  ;;  %1961 = vmatprep.mubr.msk.bf16.mxu0 %vm2219_vm1, %v2218_v0 }
  0x4f   : > { %1965 = vmatprep.subr.bf16.mxu0 %v2218_v0  ;;  %1985 = vmatprep.mubr.msk.bf16.mxu1 %vm2219_vm1, %v2218_v0 }
  0x50   : > { %1989 = vmatprep.subr.bf16.mxu1 %v2218_v0 }
  0x58   : > { %1962 = vmatmul.mubr.msk.bf16.vlgmr.msra.gmra.mrb[4].mxu0 %vm222_vm2, %v193_v32 }
  0x59   : > { %1966 = vmatpush3.bf16.msra.mxu0 %v2314_v25  ;;  %1986 = vmatmul.mubr.msk.bf16.vlgmr.msra.gmra.mrb[4].mxu1 %vm222_vm2, %v194_v39 }
  0x5a   : > { %1990 = vmatpush3.bf16.msra.mxu1 %v2314_v25  ;;  %1967 = vmatprep.mubr.msk.bf16.mxu0 %vm2219_vm1, %v2218_v0 }
  0x5b   : > { %1991 = vmatprep.mubr.msk.bf16.mxu1 %vm2219_vm1, %v2218_v0  ;;  %1995 = vmatprep.subr.bf16.mxu0 %v2218_v0 }
  0x5c   : > { %2019 = vmatprep.subr.bf16.mxu1 %v2218_v0 }
  0x64   : > { %1968 = vmatmul.mubr.msk.bf16.vlgmr.msra.gmra.mrb[4].mxu0 %vm222_vm2, %v758_v36 }
  0x65   : > { %1992 = vmatmul.mubr.msk.bf16.vlgmr.msra.gmra.mrb[4].mxu1 %vm222_vm2, %v940_v43  ;;  %1996 = vmatpush3.bf16.msra.mxu0 %v2258_v2 }
  0x66   : > { %2020 = vmatpush3.bf16.msra.mxu1 %v2258_v2  ;;  %1997 = vmatprep.mubr.msk.bf16.mxu0 %vm2219_vm1, %v2218_v0 }
  0x67   : > { %2001 = vmatprep.subr.bf16.mxu0 %v2218_v0  ;;  %2021 = vmatprep.mubr.msk.bf16.mxu1 %vm2219_vm1, %v2218_v0 }
  0x68   : > { %2025 = vmatprep.subr.bf16.mxu1 %v2218_v0 }
  0x6c   : > { %1998 = vmatmul.mubr.msk.bf16.vlgmr.msra.gmra.mrb[8].mxu0 %vm222_vm2, %v194_v39 }
  0x6d   : > { %2002 = vmatpush3.bf16.msra.mxu0 %v2279_v8  ;;  %2022 = vmatmul.mubr.msk.bf16.vlgmr.msra.gmra.mrb[8].mxu1 %vm222_vm2, %v195_v46 }
  0x6e   : > { %2026 = vmatpush3.bf16.msra.mxu1 %v2279_v8  ;;  %2003 = vmatprep.mubr.msk.bf16.mxu0 %vm2219_vm1, %v2218_v0 }
  0x6f   : > { %2007 = vmatprep.subr.bf16.mxu0 %v2218_v0  ;;  %2027 = vmatprep.mubr.msk.bf16.mxu1 %vm2219_vm1, %v2218_v0 }
  0x70   : > { %2031 = vmatprep.subr.bf16.mxu1 %v2218_v0 }
  0x78   : > { %2004 = vmatmul.mubr.msk.bf16.vlgmr.msra.gmra.mrb[8].mxu0 %vm222_vm2, %v940_v43 }
  0x79   : > { %2008 = vmatpush3.bf16.msra.mxu0 %v2296_v20  ;;  %2028 = vmatmul.mubr.msk.bf16.vlgmr.msra.gmra.mrb[8].mxu1 %vm222_vm2, %v1122_v50 }
  0x7a   : > { %2032 = vmatpush3.bf16.msra.mxu1 %v2296_v20  ;;  %2009 = vmatprep.mubr.msk.bf16.mxu0 %vm2219_vm1, %v2218_v0 }
  0x7b   : > { %2013 = vmatprep.subr.bf16.mxu0 %v2218_v0  ;;  %2033 = vmatprep.mubr.msk.bf16.mxu1 %vm2219_vm1, %v2218_v0 }
  0x7c   : > { %2037 = vmatprep.subr.bf16.mxu1 %v2218_v0 }
  0x84   : > { %2010 = vmatmul.mubr.msk.bf16.vlgmr.msra.gmra.mrb[8].mxu0 %vm222_vm2, %v195_v46 }
  0x85   : > { %2014 = vmatpush3.bf16.msra.mxu0 %v2314_v25  ;;  %2034 = vmatmul.mubr.msk.bf16.vlgmr.msra.gmra.mrb[8].mxu1 %vm222_vm2, %v196_v53 }
  0x86   : > { %2038 = vmatpush3.bf16.msra.mxu1 %v2314_v25  ;;  %2015 = vmatprep.mubr.msk.bf16.mxu0 %vm2219_vm1, %v2218_v0 }
  0x87   : > { %2039 = vmatprep.mubr.msk.bf16.mxu1 %vm2219_vm1, %v2218_v0  ;;  %2043 = vmatprep.subr.bf16.mxu0 %v2218_v0 }
  0x88   : > { %2067 = vmatprep.subr.bf16.mxu1 %v2218_v0 }
  0x90   : > { %2016 = vmatmul.mubr.msk.bf16.vlgmr.msra.gmra.mrb[8].mxu0 %vm222_vm2, %v1122_v50 }
  0x91   : > { %2040 = vmatmul.mubr.msk.bf16.vlgmr.msra.gmra.mrb[8].mxu1 %vm222_vm2, %v1304_v57  ;;  %2044 = vmatpush3.bf16.msra.mxu0 %v2258_v2 }
  0x92   : > { %2068 = vmatpush3.bf16.msra.mxu1 %v2258_v2  ;;  %2045 = vmatprep.mubr.msk.bf16.mxu0 %vm2219_vm1, %v2218_v0  ;;  %v188_v2 = vld [vmem:[%s2273_s21 + $0x80] sm:$0xff] }
  0x93   : > { %2049 = vmatprep.subr.bf16.mxu0 %v2218_v0  ;;  %2069 = vmatprep.mubr.msk.bf16.mxu1 %vm2219_vm1, %v2218_v0  ;;  %v198_v4 = vpack.c.bf16 %v189_v3, %v188_v2 }
  0x94   : > { %2073 = vmatprep.subr.bf16.mxu1 %v2218_v0 }
  0x95   : > { %v1665_v5 = vshll.u32 %v198_v4, 16  ;;  %v1663_v6 = vshrl.u32 %v198_v4, 16 }
  0x97   : > { %v1667_v7 = vrot.slane %v1665_v5, 1 }
  0x98   : > { %2046 = vmatmul.mubr.msk.bf16.vlgmr.msra.gmra.mrb[12].mxu0 %vm222_vm2, %v196_v53 }
  0x99   : > { %2050 = vmatpush3.bf16.msra.mxu0 %v2279_v8  ;;  %2070 = vmatmul.mubr.msk.bf16.vlgmr.msra.gmra.mrb[12].mxu1 %vm222_vm2, %v197_v60 }
  0x9a   : > { %2074 = vmatpush3.bf16.msra.mxu1 %v2279_v8  ;;  %2051 = vmatprep.mubr.msk.bf16.mxu0 %vm2219_vm1, %v2218_v0  ;;  %v1668_v8 = vor.u32 %v1667_v7, %v1663_v6 }
  0x9b   : > { %2055 = vmatprep.subr.bf16.mxu0 %v2218_v0  ;;  %2075 = vmatprep.mubr.msk.bf16.mxu1 %vm2219_vm1, %v2218_v0 }
  0x9c   : > { %2079 = vmatprep.subr.bf16.mxu1 %v2218_v0 }
  0xa4   : > { %2052 = vmatmul.mubr.msk.bf16.vlgmr.msra.gmra.mrb[12].mxu0 %vm222_vm2, %v1304_v57 }
  0xa5   : > { %2056 = vmatpush3.bf16.msra.mxu0 %v2296_v20  ;;  %2076 = vmatmul.mubr.msk.bf16.vlgmr.msra.gmra.mrb[12].mxu1 %vm222_vm2, %v1486_v1 }
  0xa6   : > { %2080 = vmatpush3.bf16.msra.mxu1 %v2296_v20  ;;  %2057 = vmatprep.mubr.msk.bf16.mxu0 %vm2219_vm1, %v2218_v0 }
  0xa7   : > { %2061 = vmatprep.subr.bf16.mxu0 %v2218_v0  ;;  %2081 = vmatprep.mubr.msk.bf16.mxu1 %vm2219_vm1, %v2218_v0 }
  0xa8   : > { %2085 = vmatprep.subr.bf16.mxu1 %v2218_v0 }
  0xb0   : > { %2058 = vmatmul.mubr.msk.bf16.vlgmr.msra.gmra.mrb[12].mxu0 %vm222_vm2, %v197_v60 }
  0xb1   : > { %2062 = vmatpush3.bf16.msra.mxu0 %v2314_v25  ;;  %2082 = vmatmul.mubr.msk.bf16.vlgmr.msra.gmra.mrb[12].mxu1 %vm222_vm2, %v198_v4 }
  0xb2   : > { %2086 = vmatpush3.bf16.msra.mxu1 %v2314_v25  ;;  %2063 = vmatprep.mubr.msk.bf16.mxu0 %vm2219_vm1, %v2218_v0 }
  0xb3   : > { %2087 = vmatprep.mubr.msk.bf16.mxu1 %vm2219_vm1, %v2218_v0 }
  0xbc   : > { %2064 = vmatmul.mubr.msk.bf16.vlgmr.msra.gmra.mrb[12].mxu0 %vm222_vm2, %v1486_v1 }
  0xbd   : > { %2088 = vmatmul.mubr.msk.bf16.vlgmr.msra.gmra.mrb[12].mxu1 %vm222_vm2, %v1668_v8 }
 0x10b   : > { %v432_v10 = vpop.f32.mrb[0].mxu0 }
 0x10c   : > { %v2091_v11 = vadd.f32 %v2461_v9, %v432_v10  ;;  %v614_v12 = vpop.f32.mrb[0].mxu1  ;;  %v1921_v13 = vpop.f32.mrb[1].mxu0 }
 0x10d   : > { %v2092_v0 = vadd.f32 %v2461_v9, %v614_v12  ;;  %v1945_v14 = vpop.f32.mrb[1].mxu1  ;;  %v435_v15 = vpop.f32.mrb[2].mxu0 }
 0x10e   : > { %vm439_vm3 = vcmp.ge.f32.partialorder %v2091_v11, 0.0  ;;  %v440_v16 = vmul.f32 0.01, %v2091_v11  ;;  %v617_v17 = vpop.f32.mrb[2].mxu1  ;;  %v1922_v18 = vpop.f32.mrb[3].mxu0 }
 0x10f   : > { %vm621_vm4 = vcmp.ge.f32.partialorder %v2092_v0, 0.0  ;;  %v622_v19 = vmul.f32 0.01, %v2092_v0  ;;  %v1946_v20 = vpop.f32.mrb[3].mxu1 }
 0x110   : > { %v441_v21 = vsel %vm439_vm3, %v2091_v11, %v440_v16 }
 0x111   : > { %v442_v22 = vpack.c.bf16 %v441_v21, %v441_v21  ;;  %v623_v23 = vsel %vm621_vm4, %v2092_v0, %v622_v19 }
 0x112   : > { %v624_v24 = vpack.c.bf16 %v623_v23, %v623_v23 }
 0x113   : > { %444 = vst.msk [vmem:[%s2469_s4] sm:$0xf] %vm443_vm5, %v442_v22 }
 0x114   : > { %1801 = vst.msk [vmem:[%s2469_s4 + $0x4] sm:$0xf] %vm443_vm5, %v624_v24 }
 0x137   : > { %v796_v25 = vpop.f32.mrb[4].mxu0 }
 0x138   : > { %v2093_v26 = vadd.f32 %v2461_v9, %v796_v25  ;;  %v978_v27 = vpop.f32.mrb[4].mxu1  ;;  %v1969_v28 = vpop.f32.mrb[5].mxu0 }
 0x139   : > { %v2094_v29 = vadd.f32 %v2461_v9, %v978_v27  ;;  %v1993_v30 = vpop.f32.mrb[5].mxu1  ;;  %v799_v31 = vpop.f32.mrb[6].mxu0 }
 0x13a   : > { %vm803_vm6 = vcmp.ge.f32.partialorder %v2093_v26, 0.0  ;;  %v804_v32 = vmul.f32 0.01, %v2093_v26  ;;  %v981_v33 = vpop.f32.mrb[6].mxu1  ;;  %v1970_v34 = vpop.f32.mrb[7].mxu0 }
 0x13b   : > { %vm985_vm7 = vcmp.ge.f32.partialorder %v2094_v29, 0.0  ;;  %v986_v35 = vmul.f32 0.01, %v2094_v29  ;;  %v1994_v36 = vpop.f32.mrb[7].mxu1 }
 0x13c   : > { %v805_v37 = vsel %vm803_vm6, %v2093_v26, %v804_v32 }
 0x13d   : > { %v806_v38 = vpack.c.bf16 %v805_v37, %v805_v37  ;;  %v987_v39 = vsel %vm985_vm7, %v2094_v29, %v986_v35 }
 0x13e   : > { %v988_v40 = vpack.c.bf16 %v987_v39, %v987_v39 }
 0x13f   : > { %1806 = vst.msk [vmem:[%s2469_s4 + $0x8] sm:$0xf] %vm443_vm5, %v806_v38 }
 0x140   : > { %1811 = vst.msk [vmem:[%s2469_s4 + $0xc] sm:$0xf] %vm443_vm5, %v988_v40 }
 0x163   : > { %v1160_v41 = vpop.f32.mrb[8].mxu0 }
 0x164   : > { %v2095_v42 = vadd.f32 %v2461_v9, %v1160_v41  ;;  %v1342_v43 = vpop.f32.mrb[8].mxu1  ;;  %v2017_v44 = vpop.f32.mrb[9].mxu0 }
 0x165   : > { %v2096_v45 = vadd.f32 %v2461_v9, %v1342_v43  ;;  %v2041_v46 = vpop.f32.mrb[9].mxu1  ;;  %v1163_v47 = vpop.f32.mrb[10].mxu0 }
 0x166   : > { %vm1167_vm8 = vcmp.ge.f32.partialorder %v2095_v42, 0.0  ;;  %v1168_v48 = vmul.f32 0.01, %v2095_v42  ;;  %v1345_v49 = vpop.f32.mrb[10].mxu1  ;;  %v2018_v50 = vpop.f32.mrb[11].mxu0 }
 0x167   : > { %vm1349_vm9 = vcmp.ge.f32.partialorder %v2096_v45, 0.0  ;;  %v1350_v51 = vmul.f32 0.01, %v2096_v45  ;;  %v2042_v52 = vpop.f32.mrb[11].mxu1 }
 0x168   : > { %v1169_v53 = vsel %vm1167_vm8, %v2095_v42, %v1168_v48 }
 0x169   : > { %v1170_v54 = vpack.c.bf16 %v1169_v53, %v1169_v53  ;;  %v1351_v55 = vsel %vm1349_vm9, %v2096_v45, %v1350_v51 }
 0x16a   : > { %v1352_v56 = vpack.c.bf16 %v1351_v55, %v1351_v55 }
 0x16b   : > { %1816 = vst.msk [vmem:[%s2469_s4 + $0x10] sm:$0xf] %vm443_vm5, %v1170_v54 }
 0x16c   : > { %1821 = vst.msk [vmem:[%s2469_s4 + $0x14] sm:$0xf] %vm443_vm5, %v1352_v56 }
 0x18f   : > { %v1524_v57 = vpop.f32.mrb[12].mxu0 }
 0x190   : > { %v2097_v58 = vadd.f32 %v2461_v9, %v1524_v57  ;;  %v1706_v59 = vpop.f32.mrb[12].mxu1  ;;  %v2065_v60 = vpop.f32.mrb[13].mxu0 }
 0x191   : > { %v2098_v61 = vadd.f32 %v2461_v9, %v1706_v59  ;;  %v2089_v62 = vpop.f32.mrb[13].mxu1  ;;  %v1527_v63 = vpop.f32.mrb[14].mxu0 }
 0x192   : > { %vm1531_vm10 = vcmp.ge.f32.partialorder %v2097_v58, 0.0  ;;  %v1532_v1 = vmul.f32 0.01, %v2097_v58  ;;  %v1709_v2 = vpop.f32.mrb[14].mxu1  ;;  %v2066_v3 = vpop.f32.mrb[15].mxu0 }
 0x193   : > { %vm1713_vm11 = vcmp.ge.f32.partialorder %v2098_v61, 0.0  ;;  %v1714_v4 = vmul.f32 0.01, %v2098_v61  ;;  %v2090_v5 = vpop.f32.mrb[15].mxu1 }
 0x194   : > { %v1533_v6 = vsel %vm1531_vm10, %v2097_v58, %v1532_v1 }
 0x195   : > { %v1534_v7 = vpack.c.bf16 %v1533_v6, %v1533_v6  ;;  %v1715_v8 = vsel %vm1713_vm11, %v2098_v61, %v1714_v4 }
 0x196   : > { %v1716_v10 = vpack.c.bf16 %v1715_v8, %v1715_v8 }
 0x197   : > { %1826 = vst.msk [vmem:[%s2469_s4 + $0x18] sm:$0xf] %vm443_vm5, %v1534_v7 }
 0x198   : > { %1831 = vst.msk [vmem:[%s2469_s4 + $0x1c] sm:$0xf] %vm443_vm5, %v1716_v10 }
 0x199 PF: > { %s13_s12 = sadd.s32 1, %s2216_s12  }
 0x19a   : > { %p10_p4 = scmp.ge.s32.totalorder %s13_s12, 4  }
 0x19c   :  { %12 = sbr.rel (!%p10_p4) target bundleno = 1 (0x1), region = 72 }

// kernel: discriminator_forward.5
= control target key start
LH: loop header
LB: loop body
LE: loop exit
PB: predicated region body
PF: predicated region fallthrough
CT: control target
= control target key end

     0   :  { %v268_v6 = vmov 1966171168   ;;  %v57_v8 = vlaneseq  ;;  %vm206_vm0 = vcmask 156672   ;;  %s338_s1 = inlined_call_operand.vmem [shape: bf16[256,20], index: 1, kind: input, shape index: {}]   ;;  %s339_s0 = inlined_call_operand.vmem [shape: bf16[2,256], index: 0, kind: input, shape index: {}]   ;;  %s340_s2 = inlined_call_operand.vmem [shape: f32[2,20], index: 2, kind: output, shape index: {}]  }
   0x1   :  { %v252_v0 = vld [vmem:[%s338_s1 + $0x40] sm:$0xff]   ;;  %v254_v2 = vld [vmem:[%s338_s1 + $0x48] sm:$0xff]   ;;  %v256_v4 = vld [vmem:[%s338_s1 + $0x50] sm:$0xff]   ;;  %v55_v7 = vunpack.c.l.s4 %v268_v6 }
   0x2   :  { %v253_v1 = vld [vmem:[%s338_s1] sm:$0xff]   ;;  %229 = vmatprep.subr.bf16.mxu0 %v252_v0  ;;  %v255_v3 = vld [vmem:[%s338_s1 + $0x8] sm:$0xff]   ;;  %v257_v5 = vld [vmem:[%s338_s1 + $0x10] sm:$0xff]   ;;  %v58_v12 = vshrl.u32 %v57_v8, 7 }
   0x3   :  { %230 = vmatpush3.bf16.msra.mxu0 %v253_v1  ;;  %v258_v9 = vld [vmem:[%s338_s1 + $0x58] sm:$0xff]   ;;  %v56_v11 = vunpack.c.0.s8 %v55_v7  ;;  %v260_v13 = vld [vmem:[%s338_s1 + $0x60] sm:$0xff]   ;;  %v262_v16 = vld [vmem:[%s338_s1 + $0x68] sm:$0xff]  }
   0x4   :  { %231 = vmatprep.subr.bf16.mxu0 %v254_v2  ;;  %v259_v10 = vld [vmem:[%s338_s1 + $0x18] sm:$0xff]   ;;  %v261_v14 = vld [vmem:[%s338_s1 + $0x20] sm:$0xff]   ;;  %v263_v19 = vld [vmem:[%s338_s1 + $0x28] sm:$0xff]  }
   0x5   :  { %v59_v15 = vsub.s32 %v56_v11, %v58_v12  ;;  %v212_v17 = vld.sshfl [vmem:[%s339_s0] sm:$0x11 pattern:$0x75316420]  ;;  %v264_v21 = vld [vmem:[%s338_s1 + $0x70] sm:$0xff]   ;;  %v266_v23 = vld [vmem:[%s338_s1 + $0x78] sm:$0xff]  }
   0x6   :  { %v53_v18 = vcombine.high %v212_v17, %v212_v17  ;;  %v265_v22 = vld [vmem:[%s338_s1 + $0x30] sm:$0xff]   ;;  %v267_v24 = vld [vmem:[%s338_s1 + $0x38] sm:$0xff]  }
   0x7   :  { %232 = vmatpush3.bf16.msra.mxu0 %v255_v3  ;;  %v60_v25 = vrot.slane %v212_v17, %v59_v15 }
   0x8   :  { %233 = vmatprep.subr.bf16.mxu0 %v256_v4  ;;  %v67_v20 = vrot.slane %v53_v18, %v59_v15 }
   0xa   :  { %198 = vmatprep.mubr.bf16.mxu0 %v67_v20 }
   0xb   :  { %234 = vmatpush3.bf16.msra.mxu0 %v257_v5 }
   0xc   :  { %235 = vmatprep.subr.bf16.mxu0 %v258_v9 }
   0xf   :  { %236 = vmatpush3.bf16.msra.mxu0 %v259_v10 }
  0x10   :  { %237 = vmatprep.subr.bf16.mxu0 %v260_v13 }
  0x13   :  { %238 = vmatpush3.bf16.msra.mxu0 %v261_v14 }
  0x14   :  { %239 = vmatprep.subr.bf16.mxu0 %v262_v16 }
  0x17   :  { %240 = vmatpush3.bf16.msra.mxu0 %v263_v19 }
  0x18   :  { %241 = vmatprep.subr.bf16.mxu0 %v264_v21 }
  0x1b   :  { %242 = vmatpush3.bf16.msra.mxu0 %v265_v22 }
  0x1c   :  { %243 = vmatprep.subr.bf16.mxu0 %v266_v23 }
  0x1f   :  { %244 = vmatpush3.bf16.msra.mxu0 %v267_v24 }
  0x22   :  { %199 = vmatmul.mubr.bf16.vlgmr.msra.gmra.mrb[0].mxu0 %v60_v25 }
  0xf5   :  { %v245_v26 = vpop.f32.mrb[0].mxu0 }
  0xf6   :  { %v246_v27 = vpop.f32.mrb[1].mxu0 }
  0xf7   :  { %v247_v28 = vadd.f32 %v246_v27, %v245_v26  ;;  %v248_v29 = vpop.f32.mrb[2].mxu0 }
  0xf8   :  { %v249_v30 = vpop.f32.mrb[3].mxu0 }
  0xf9   :  { %207 = vst.msk [vmem:[%s340_s2] sm:$0x3] %vm206_vm0, %v247_v28 }

</bundles_post_ra>
